<compile_context>
chip_gen: v7x
topology: tpu7x:2x2x1
jax: 0.10.0
libtpu: 0.0.40
codegen_flags: <defaults>
</compile_context>

<pallas_src>
import functools

import jax
import jax.numpy as jnp
from jax import lax
from jax.experimental import pallas as pl
from jax.experimental.pallas import tpu as pltpu


def _round_up(x, m):
    return (x + m - 1) // m * m


def lstm_kernel(x_ref, wih_ref, whh_ref, b_ref, wout_ref, bout_ref,
                out_ref, h_sc, c_sc, xg_sc, *, hp, tc):
    """One time-chunk of the LSTM recurrence + final Linear on the last chunk.

    x_ref    : (Tc, Bp, E)    embedded input chunk, time-major
    wih_ref  : (E, 4*Hp)      input->gates weight, gate order [i,f,o,g], padded
    whh_ref  : (Hp, 4*Hp)     hidden->gates weight, gate order [i,f,o,g], padded
    b_ref    : (1, 4*Hp)      b_ih + b_hh, reordered + padded
    wout_ref : (Hp, OUTP)     final linear weight, padded to 128 lanes
    bout_ref : (1, OUTP)      final linear bias, padded
    out_ref  : (Bp, OUTP)     padded logits
    h_sc/c_sc: (Bp, Hp)       recurrent state, persists across grid steps
    xg_sc    : (Tc, Bp, 4*Hp) precomputed input projections for this chunk
    """
    bp = h_sc.shape[0]
    e = x_ref.shape[2]

    @pl.when(pl.program_id(0) == 0)
    def _():
        h_sc[...] = jnp.zeros_like(h_sc)
        c_sc[...] = jnp.zeros_like(c_sc)

    # --- Hoisted input projection: one (Tc*Bp, E) x (E, 4Hp) MXU matmul, ----
    # --- bias folded in once per chunk (not per step). -----------------------
    x_flat = x_ref[...].reshape(tc * bp, e)
    xg = jnp.dot(x_flat, wih_ref[...],
                 preferred_element_type=jnp.float32) + b_ref[...]
    xg_sc[...] = xg.reshape(tc, bp, 4 * hp)

    # --- Serial recurrence: only h @ W_hh on the critical path. --------------
    def step(t, carry):
        gates = xg_sc[t] + jnp.dot(h_sc[...], whh_ref[...],
                                   preferred_element_type=jnp.float32)
        # Gate order [i, f, o, g]: one contiguous sigmoid slab + one tanh slab,
        # all slices on 128-lane boundaries.
        ifo = jax.nn.sigmoid(gates[:, :3 * hp])
        g_g = jnp.tanh(gates[:, 3 * hp:])
        i_g = ifo[:, :hp]
        f_g = ifo[:, hp:2 * hp]
        o_g = ifo[:, 2 * hp:]
        c_new = f_g * c_sc[...] + i_g * g_g
        h_sc[...] = o_g * jnp.tanh(c_new)
        c_sc[...] = c_new
        return carry

    lax.fori_loop(0, tc, step, 0, unroll=True)

    # --- Final Linear only after the last chunk. ------------------------------
    @pl.when(pl.program_id(0) == pl.num_programs(0) - 1)
    def _():
        out_ref[...] = (jnp.dot(h_sc[...], wout_ref[...],
                                preferred_element_type=jnp.float32)
                        + bout_ref[...])


def lstm_fixed_len_forward(token_ids, params, *, time_chunk=4):
    """Forward pass mirroring LSTM_fixed_len.forward (inference mode)."""
    # Embedding lookup: plain-JAX glue (gather). padding_idx=0 row is zero.
    emb = params["embedding"][token_ids].astype(jnp.float32)      # (B, T, E)
    # TODO(synk): nn.Dropout(0.2) is identity at inference; training-mode
    # dropout is not implemented as a kernel.
    B, T, E = emb.shape
    H = params["w_hh"].shape[1]                                   # w_hh: (4H, H)
    N_OUT = params["w_out"].shape[0]                              # 5

    Hp = _round_up(max(H, 128), 128)     # lane-aligned hidden dim
    Bp = _round_up(max(B, 8), 8)         # sublane-aligned batch
    OUTP = _round_up(max(N_OUT, 128), 128)

    # ---- Weight prep: reorder gates [i,f,g,o] -> [i,f,o,g], pad to Hp. ------
    def reorder_gates(a, axis=0):
        i, f, g, o = jnp.split(a, 4, axis=axis)
        return jnp.concatenate([i, f, o, g], axis=axis)

    w_ih = reorder_gates(params["w_ih"], axis=0)                  # (4H, E)
    w_hh = reorder_gates(params["w_hh"], axis=0)                  # (4H, H)
    bias = reorder_gates(params["b_ih"] + params["b_hh"], axis=0)  # (4H,)

    def pad_gate_cols(wt):  # wt: (in, 4H) -> (in, 4Hp), zero-pad each gate
        parts = jnp.split(wt, 4, axis=1)
        parts = [jnp.pad(p, ((0, 0), (0, Hp - H))) for p in parts]
        return jnp.concatenate(parts, axis=1)

    w_ih_t = pad_gate_cols(w_ih.T)                                 # (E, 4Hp)
    w_hh_t = jnp.pad(pad_gate_cols(w_hh.T), ((0, Hp - H), (0, 0)))  # (Hp, 4Hp)
    b_parts = jnp.split(bias, 4)
    b_pad = jnp.concatenate(
        [jnp.pad(p, (0, Hp - H)) for p in b_parts]).reshape(1, 4 * Hp)

    w_out_t = jnp.pad(params["w_out"].T,
                      ((0, Hp - H), (0, OUTP - N_OUT)))            # (Hp, OUTP)
    b_out = jnp.pad(params["b_out"], (0, OUTP - N_OUT)).reshape(1, OUTP)

    # ---- Activation prep: pad batch, go time-major. -------------------------
    x = jnp.pad(emb, ((0, Bp - B), (0, 0), (0, 0)))               # (Bp, T, E)
    x_tm = jnp.transpose(x, (1, 0, 2))                            # (T, Bp, E)

    Tc = time_chunk if (time_chunk > 0 and T % time_chunk == 0) else T
    n_chunks = T // Tc

    logits_pad = pl.pallas_call(
        functools.partial(lstm_kernel, hp=Hp, tc=Tc),
        out_shape=jax.ShapeDtypeStruct((Bp, OUTP), jnp.float32),
        grid_spec=pltpu.PrefetchScalarGridSpec(
            num_scalar_prefetch=0,
            grid=(n_chunks,),
            in_specs=[
                # x chunk: pipelined over the T-grid (auto double-buffered).
                pl.BlockSpec((Tc, Bp, E), lambda t: (t, 0, 0)),
                # Weights / biases: same block every step -> stay resident.
                pl.BlockSpec((E, 4 * Hp), lambda t: (0, 0)),
                pl.BlockSpec((Hp, 4 * Hp), lambda t: (0, 0)),
                pl.BlockSpec((1, 4 * Hp), lambda t: (0, 0)),
                pl.BlockSpec((Hp, OUTP), lambda t: (0, 0)),
                pl.BlockSpec((1, OUTP), lambda t: (0, 0)),
            ],
            out_specs=pl.BlockSpec((Bp, OUTP), lambda t: (0, 0)),
            scratch_shapes=[
                pltpu.VMEM((Bp, Hp), jnp.float32),          # h
                pltpu.VMEM((Bp, Hp), jnp.float32),          # c
                pltpu.VMEM((Tc, Bp, 4 * Hp), jnp.float32),  # x-projection
            ],
        ),
        compiler_params=pltpu.CompilerParams(
            dimension_semantics=("arbitrary",)),   # recurrence is sequential
    )(x_tm, w_ih_t, w_hh_t, b_pad, w_out_t, b_out)

    return logits_pad[:B, :N_OUT]


def reference_forward(token_ids, params):
    """Pure-JAX reference for correctness check (PyTorch gate order i,f,g,o)."""
    emb = params["embedding"][token_ids].astype(jnp.float32)      # (B, T, E)
    B, T, E = emb.shape
    H = params["w_hh"].shape[1]
    w_ih_t = params["w_ih"].T
    w_hh_t = params["w_hh"].T
    b = params["b_ih"] + params["b_hh"]

    def step(carry, x_t):
        h, c = carry
        gates = x_t @ w_ih_t + h @ w_hh_t + b
        i_g = jax.nn.sigmoid(gates[:, 0 * H:1 * H])
        f_g = jax.nn.sigmoid(gates[:, 1 * H:2 * H])
        g_g = jnp.tanh(gates[:, 2 * H:3 * H])
        o_g = jax.nn.sigmoid(gates[:, 3 * H:4 * H])
        c = f_g * c + i_g * g_g
        h = o_g * jnp.tanh(c)
        return (h, c), None

    h0 = jnp.zeros((B, H), jnp.float32)
    c0 = jnp.zeros((B, H), jnp.float32)
    (h_last, _), _ = lax.scan(step, (h0, c0), jnp.transpose(emb, (1, 0, 2)))
    return h_last @ params["w_out"].T + params["b_out"]


def init_params(key, vocab_size, embedding_dim, hidden_dim):
    ks = jax.random.split(key, 7)
    scale = 0.1
    emb = scale * jax.random.normal(ks[0], (vocab_size, embedding_dim),
                                    jnp.float32)
    emb = emb.at[0].set(0.0)  # padding_idx=0
    return {
        "embedding": emb,
        # PyTorch-convention shapes:
        "w_ih": scale * jax.random.normal(ks[1], (4 * hidden_dim, embedding_dim), jnp.float32),
        "w_hh": scale * jax.random.normal(ks[2], (4 * hidden_dim, hidden_dim), jnp.float32),
        "b_ih": scale * jax.random.normal(ks[3], (4 * hidden_dim,), jnp.float32),
        "b_hh": scale * jax.random.normal(ks[4], (4 * hidden_dim,), jnp.float32),
        "w_out": scale * jax.random.normal(ks[5], (5, hidden_dim), jnp.float32),
        "b_out": scale * jax.random.normal(ks[6], (5,), jnp.float32),
    }


if __name__ == "__main__":
    vocab_size, embedding_dim, hidden_dim = 50, 16, 32
    batch, seq_len = 2, 8

    key = jax.random.PRNGKey(0)
    k_param, k_tok = jax.random.split(key)
    params = init_params(k_param, vocab_size, embedding_dim, hidden_dim)
    token_ids = jax.random.randint(k_tok, (batch, seq_len), 0, vocab_size,
                                   dtype=jnp.int32)

    out = lstm_fixed_len_forward(token_ids, params, time_chunk=4)
    out = jax.block_until_ready(out)

    ref = jax.block_until_ready(reference_forward(token_ids, params))
    assert out.shape == (batch, 5)
    assert jnp.allclose(out, ref, atol=1e-5, rtol=1e-5), (out, ref)

    print("KERNEL_OK")
</pallas_src>

<mosaic_0001>
module attributes {stable_mosaic.version = 11 : i64} {
  func.func @lstm_kernel(%arg0: i32, %arg1: memref<4x8x16xf32, #tpu.memory_space<vmem>>, %arg2: memref<16x512xf32, #tpu.memory_space<vmem>>, %arg3: memref<128x512xf32, #tpu.memory_space<vmem>>, %arg4: memref<1x512xf32, #tpu.memory_space<vmem>>, %arg5: memref<128x128xf32, #tpu.memory_space<vmem>>, %arg6: memref<1x128xf32, #tpu.memory_space<vmem>>, %arg7: memref<8x128xf32, #tpu.memory_space<vmem>>, %arg8: memref<8x128xf32, #tpu.memory_space<vmem>>, %arg9: memref<8x128xf32, #tpu.memory_space<vmem>>, %arg10: memref<4x8x512xf32, #tpu.memory_space<vmem>>) attributes {dimension_semantics = [#tpu.dimension_semantics<arbitrary>], iteration_bounds = array<i64: 2>, scalar_prefetch = 0 : i64, scratch_operands = 3 : i64, tpu.core_type = #tpu.core_type<tc>, window_params = [{transform_indices = @transform_0, window_bounds = array<i64: 4, 8, 16>}, {pipeline_mode = #tpu.pipeline_mode<synchronous>, transform_indices = @transform_1, window_bounds = array<i64: 16, 512>}, {pipeline_mode = #tpu.pipeline_mode<synchronous>, transform_indices = @transform_2, window_bounds = array<i64: 128, 512>}, {pipeline_mode = #tpu.pipeline_mode<synchronous>, transform_indices = @transform_3, window_bounds = array<i64: 1, 512>}, {pipeline_mode = #tpu.pipeline_mode<synchronous>, transform_indices = @transform_4, window_bounds = array<i64: 128, 128>}, {pipeline_mode = #tpu.pipeline_mode<synchronous>, transform_indices = @transform_5, window_bounds = array<i64: 1, 128>}, {pipeline_mode = #tpu.pipeline_mode<synchronous>, transform_indices = @transform_6, window_bounds = array<i64: 8, 128>}]} {
    %c0_i32 = arith.constant 0 : i32
    %0 = arith.cmpi eq, %arg0, %c0_i32 : i32
    %1 = arith.extui %0 : i1 to i32
    %c0_i32_0 = arith.constant 0 : i32
    %2 = arith.cmpi ne, %1, %c0_i32_0 : i32
    scf.if %2 {
      %cst_69 = arith.constant 0.000000e+00 : f32
      %119 = vector.broadcast %cst_69 : f32 to vector<8x128xf32>
      %c0_70 = arith.constant 0 : index
      %c0_71 = arith.constant 0 : index
      %120 = vector.load %arg8[%c0_70, %c0_71] : memref<8x128xf32, #tpu.memory_space<vmem>>, vector<8x128xf32>
      tpu.vector_store %arg8[%c0_70, %c0_71], %119 {strides = array<i32>} : memref<8x128xf32, #tpu.memory_space<vmem>>, vector<8x128xf32>,
      %cst_72 = arith.constant 0.000000e+00 : f32
      %121 = vector.broadcast %cst_72 : f32 to vector<8x128xf32>
      %c0_73 = arith.constant 0 : index
      %c0_74 = arith.constant 0 : index
      %122 = vector.load %arg9[%c0_73, %c0_74] : memref<8x128xf32, #tpu.memory_space<vmem>>, vector<8x128xf32>
      tpu.vector_store %arg9[%c0_73, %c0_74], %121 {strides = array<i32>} : memref<8x128xf32, #tpu.memory_space<vmem>>, vector<8x128xf32>,
    } else {
    }
    %c0 = arith.constant 0 : index
    %c0_1 = arith.constant 0 : index
    %c0_2 = arith.constant 0 : index
    %3 = vector.load %arg1[%c0, %c0_1, %c0_2] : memref<4x8x16xf32, #tpu.memory_space<vmem>>, vector<4x8x16xf32>
    %4 = vector.shape_cast %3 : vector<4x8x16xf32> to vector<32x16xf32>
    %c0_3 = arith.constant 0 : index
    %c0_4 = arith.constant 0 : index
    %5 = vector.load %arg2[%c0_3, %c0_4] : memref<16x512xf32, #tpu.memory_space<vmem>>, vector<16x512xf32>
    %cst = arith.constant dense<0.000000e+00> : vector<32x512xf32>
    %6 = tpu.matmul %4, %5, %cst {dimension_numbers = #tpu.dot_dimension_numbers<[1], [0], [0], [1], [0, 0, 1, 1], [], []>} : vector<32x16xf32>, vector<16x512xf32>, vector<32x512xf32> -> vector<32x512xf32>
    %c0_5 = arith.constant 0 : index
    %c0_6 = arith.constant 0 : index
    %7 = vector.load %arg4[%c0_5, %c0_6] : memref<1x512xf32, #tpu.memory_space<vmem>>, vector<1x512xf32>
    %8 = vector.broadcast %7 : vector<1x512xf32> to vector<32x512xf32>
    %9 = arith.addf %6, %8 : vector<32x512xf32>
    %10 = vector.shape_cast %9 : vector<32x512xf32> to vector<4x8x512xf32>
    %c0_7 = arith.constant 0 : index
    %c0_8 = arith.constant 0 : index
    %c0_9 = arith.constant 0 : index
    %11 = vector.load %arg10[%c0_7, %c0_8, %c0_9] : memref<4x8x512xf32, #tpu.memory_space<vmem>>, vector<4x8x512xf32>
    tpu.vector_store %arg10[%c0_7, %c0_8, %c0_9], %10 {strides = array<i32>} : memref<4x8x512xf32, #tpu.memory_space<vmem>>, vector<4x8x512xf32>,
    %c0_i32_10 = arith.constant 0 : i32
    %12 = arith.index_cast %c0_i32_10 : i32 to index
    %c0_11 = arith.constant 0 : index
    %c0_12 = arith.constant 0 : index
    %13 = vector.load %arg10[%12, %c0_11, %c0_12] : memref<4x8x512xf32, #tpu.memory_space<vmem>>, vector<1x8x512xf32>
    %14 = vector.shape_cast %13 : vector<1x8x512xf32> to vector<8x512xf32>
    %c0_13 = arith.constant 0 : index
    %c0_14 = arith.constant 0 : index
    %15 = vector.load %arg8[%c0_13, %c0_14] : memref<8x128xf32, #tpu.memory_space<vmem>>, vector<8x128xf32>
    %c0_15 = arith.constant 0 : index
    %c0_16 = arith.constant 0 : index
    %16 = vector.load %arg3[%c0_15, %c0_16] : memref<128x512xf32, #tpu.memory_space<vmem>>, vector<128x512xf32>
    %cst_17 = arith.constant dense<0.000000e+00> : vector<8x512xf32>
    %17 = tpu.matmul %15, %16, %cst_17 {dimension_numbers = #tpu.dot_dimension_numbers<[1], [0], [0], [1], [0, 0, 1, 1], [], []>} : vector<8x128xf32>, vector<128x512xf32>, vector<8x512xf32> -> vector<8x512xf32>
    %18 = arith.addf %14, %17 : vector<8x512xf32>
    %19 = vector.extract_strided_slice %18 {offsets = [0, 0], sizes = [8, 384], strides = [1, 1]} : vector<8x512xf32> to vector<8x384xf32>
    %20 = arith.negf %19 : vector<8x384xf32>
    %21 = math.exp %20 : vector<8x384xf32>
    %cst_18 = arith.constant 1.000000e+00 : f32
    %22 = vector.broadcast %cst_18 : f32 to vector<8x384xf32>
    %23 = arith.addf %22, %21 : vector<8x384xf32>
    %24 = arith.divf %22, %23 : vector<8x384xf32>
    %25 = vector.extract_strided_slice %18 {offsets = [0, 384], sizes = [8, 128], strides = [1, 1]} : vector<8x512xf32> to vector<8x128xf32>
    %26 = math.tanh %25 : vector<8x128xf32>
    %27 = vector.extract_strided_slice %24 {offsets = [0, 0], sizes = [8, 128], strides = [1, 1]} : vector<8x384xf32> to vector<8x128xf32>
    %28 = vector.extract_strided_slice %24 {offsets = [0, 128], sizes = [8, 128], strides = [1, 1]} : vector<8x384xf32> to vector<8x128xf32>
    %29 = vector.extract_strided_slice %24 {offsets = [0, 256], sizes = [8, 128], strides = [1, 1]} : vector<8x384xf32> to vector<8x128xf32>
    %c0_19 = arith.constant 0 : index
    %c0_20 = arith.constant 0 : index
    %30 = vector.load %arg9[%c0_19, %c0_20] : memref<8x128xf32, #tpu.memory_space<vmem>>, vector<8x128xf32>
    %31 = arith.mulf %28, %30 : vector<8x128xf32>
    %32 = arith.mulf %27, %26 : vector<8x128xf32>
    %33 = arith.addf %31, %32 : vector<8x128xf32>
    %34 = math.tanh %33 : vector<8x128xf32>
    %35 = arith.mulf %29, %34 : vector<8x128xf32>
    %c0_21 = arith.constant 0 : index
    %c0_22 = arith.constant 0 : index
    %36 = vector.load %arg8[%c0_21, %c0_22] : memref<8x128xf32, #tpu.memory_space<vmem>>, vector<8x128xf32>
    tpu.vector_store %arg8[%c0_21, %c0_22], %35 {strides = array<i32>} : memref<8x128xf32, #tpu.memory_space<vmem>>, vector<8x128xf32>,
    %c0_23 = arith.constant 0 : index
    %c0_24 = arith.constant 0 : index
    %37 = vector.load %arg9[%c0_23, %c0_24] : memref<8x128xf32, #tpu.memory_space<vmem>>, vector<8x128xf32>
    tpu.vector_store %arg9[%c0_23, %c0_24], %33 {strides = array<i32>} : memref<8x128xf32, #tpu.memory_space<vmem>>, vector<8x128xf32>,
    %c1_i32 = arith.constant 1 : i32
    %38 = arith.index_cast %c1_i32 : i32 to index
    %c0_25 = arith.constant 0 : index
    %c0_26 = arith.constant 0 : index
    %39 = vector.load %arg10[%38, %c0_25, %c0_26] : memref<4x8x512xf32, #tpu.memory_space<vmem>>, vector<1x8x512xf32>
    %40 = vector.shape_cast %39 : vector<1x8x512xf32> to vector<8x512xf32>
    %c0_27 = arith.constant 0 : index
    %c0_28 = arith.constant 0 : index
    %41 = vector.load %arg8[%c0_27, %c0_28] : memref<8x128xf32, #tpu.memory_space<vmem>>, vector<8x128xf32>
    %c0_29 = arith.constant 0 : index
    %c0_30 = arith.constant 0 : index
    %42 = vector.load %arg3[%c0_29, %c0_30] : memref<128x512xf32, #tpu.memory_space<vmem>>, vector<128x512xf32>
    %cst_31 = arith.constant dense<0.000000e+00> : vector<8x512xf32>
    %43 = tpu.matmul %41, %42, %cst_31 {dimension_numbers = #tpu.dot_dimension_numbers<[1], [0], [0], [1], [0, 0, 1, 1], [], []>} : vector<8x128xf32>, vector<128x512xf32>, vector<8x512xf32> -> vector<8x512xf32>
    %44 = arith.addf %40, %43 : vector<8x512xf32>
    %45 = vector.extract_strided_slice %44 {offsets = [0, 0], sizes = [8, 384], strides = [1, 1]} : vector<8x512xf32> to vector<8x384xf32>
    %46 = arith.negf %45 : vector<8x384xf32>
    %47 = math.exp %46 : vector<8x384xf32>
    %cst_32 = arith.constant 1.000000e+00 : f32
    %48 = vector.broadcast %cst_32 : f32 to vector<8x384xf32>
    %49 = arith.addf %48, %47 : vector<8x384xf32>
    %50 = arith.divf %48, %49 : vector<8x384xf32>
    %51 = vector.extract_strided_slice %44 {offsets = [0, 384], sizes = [8, 128], strides = [1, 1]} : vector<8x512xf32> to vector<8x128xf32>
    %52 = math.tanh %51 : vector<8x128xf32>
    %53 = vector.extract_strided_slice %50 {offsets = [0, 0], sizes = [8, 128], strides = [1, 1]} : vector<8x384xf32> to vector<8x128xf32>
    %54 = vector.extract_strided_slice %50 {offsets = [0, 128], sizes = [8, 128], strides = [1, 1]} : vector<8x384xf32> to vector<8x128xf32>
    %55 = vector.extract_strided_slice %50 {offsets = [0, 256], sizes = [8, 128], strides = [1, 1]} : vector<8x384xf32> to vector<8x128xf32>
    %c0_33 = arith.constant 0 : index
    %c0_34 = arith.constant 0 : index
    %56 = vector.load %arg9[%c0_33, %c0_34] : memref<8x128xf32, #tpu.memory_space<vmem>>, vector<8x128xf32>
    %57 = arith.mulf %54, %56 : vector<8x128xf32>
    %58 = arith.mulf %53, %52 : vector<8x128xf32>
    %59 = arith.addf %57, %58 : vector<8x128xf32>
    %60 = math.tanh %59 : vector<8x128xf32>
    %61 = arith.mulf %55, %60 : vector<8x128xf32>
    %c0_35 = arith.constant 0 : index
    %c0_36 = arith.constant 0 : index
    %62 = vector.load %arg8[%c0_35, %c0_36] : memref<8x128xf32, #tpu.memory_space<vmem>>, vector<8x128xf32>
    tpu.vector_store %arg8[%c0_35, %c0_36], %61 {strides = array<i32>} : memref<8x128xf32, #tpu.memory_space<vmem>>, vector<8x128xf32>,
    %c0_37 = arith.constant 0 : index
    %c0_38 = arith.constant 0 : index
    %63 = vector.load %arg9[%c0_37, %c0_38] : memref<8x128xf32, #tpu.memory_space<vmem>>, vector<8x128xf32>
    tpu.vector_store %arg9[%c0_37, %c0_38], %59 {strides = array<i32>} : memref<8x128xf32, #tpu.memory_space<vmem>>, vector<8x128xf32>,
    %c2_i32 = arith.constant 2 : i32
    %64 = arith.index_cast %c2_i32 : i32 to index
    %c0_39 = arith.constant 0 : index
    %c0_40 = arith.constant 0 : index
    %65 = vector.load %arg10[%64, %c0_39, %c0_40] : memref<4x8x512xf32, #tpu.memory_space<vmem>>, vector<1x8x512xf32>
    %66 = vector.shape_cast %65 : vector<1x8x512xf32> to vector<8x512xf32>
    %c0_41 = arith.constant 0 : index
    %c0_42 = arith.constant 0 : index
    %67 = vector.load %arg8[%c0_41, %c0_42] : memref<8x128xf32, #tpu.memory_space<vmem>>, vector<8x128xf32>
    %c0_43 = arith.constant 0 : index
    %c0_44 = arith.constant 0 : index
    %68 = vector.load %arg3[%c0_43, %c0_44] : memref<128x512xf32, #tpu.memory_space<vmem>>, vector<128x512xf32>
    %cst_45 = arith.constant dense<0.000000e+00> : vector<8x512xf32>
    %69 = tpu.matmul %67, %68, %cst_45 {dimension_numbers = #tpu.dot_dimension_numbers<[1], [0], [0], [1], [0, 0, 1, 1], [], []>} : vector<8x128xf32>, vector<128x512xf32>, vector<8x512xf32> -> vector<8x512xf32>
    %70 = arith.addf %66, %69 : vector<8x512xf32>
    %71 = vector.extract_strided_slice %70 {offsets = [0, 0], sizes = [8, 384], strides = [1, 1]} : vector<8x512xf32> to vector<8x384xf32>
    %72 = arith.negf %71 : vector<8x384xf32>
    %73 = math.exp %72 : vector<8x384xf32>
    %cst_46 = arith.constant 1.000000e+00 : f32
    %74 = vector.broadcast %cst_46 : f32 to vector<8x384xf32>
    %75 = arith.addf %74, %73 : vector<8x384xf32>
    %76 = arith.divf %74, %75 : vector<8x384xf32>
    %77 = vector.extract_strided_slice %70 {offsets = [0, 384], sizes = [8, 128], strides = [1, 1]} : vector<8x512xf32> to vector<8x128xf32>
    %78 = math.tanh %77 : vector<8x128xf32>
    %79 = vector.extract_strided_slice %76 {offsets = [0, 0], sizes = [8, 128], strides = [1, 1]} : vector<8x384xf32> to vector<8x128xf32>
    %80 = vector.extract_strided_slice %76 {offsets = [0, 128], sizes = [8, 128], strides = [1, 1]} : vector<8x384xf32> to vector<8x128xf32>
    %81 = vector.extract_strided_slice %76 {offsets = [0, 256], sizes = [8, 128], strides = [1, 1]} : vector<8x384xf32> to vector<8x128xf32>
    %c0_47 = arith.constant 0 : index
    %c0_48 = arith.constant 0 : index
    %82 = vector.load %arg9[%c0_47, %c0_48] : memref<8x128xf32, #tpu.memory_space<vmem>>, vector<8x128xf32>
    %83 = arith.mulf %80, %82 : vector<8x128xf32>
    %84 = arith.mulf %79, %78 : vector<8x128xf32>
    %85 = arith.addf %83, %84 : vector<8x128xf32>
    %86 = math.tanh %85 : vector<8x128xf32>
    %87 = arith.mulf %81, %86 : vector<8x128xf32>
    %c0_49 = arith.constant 0 : index
    %c0_50 = arith.constant 0 : index
    %88 = vector.load %arg8[%c0_49, %c0_50] : memref<8x128xf32, #tpu.memory_space<vmem>>, vector<8x128xf32>
    tpu.vector_store %arg8[%c0_49, %c0_50], %87 {strides = array<i32>} : memref<8x128xf32, #tpu.memory_space<vmem>>, vector<8x128xf32>,
    %c0_51 = arith.constant 0 : index
    %c0_52 = arith.constant 0 : index
    %89 = vector.load %arg9[%c0_51, %c0_52] : memref<8x128xf32, #tpu.memory_space<vmem>>, vector<8x128xf32>
    tpu.vector_store %arg9[%c0_51, %c0_52], %85 {strides = array<i32>} : memref<8x128xf32, #tpu.memory_space<vmem>>, vector<8x128xf32>,
    %c3_i32 = arith.constant 3 : i32
    %90 = arith.index_cast %c3_i32 : i32 to index
    %c0_53 = arith.constant 0 : index
    %c0_54 = arith.constant 0 : index
    %91 = vector.load %arg10[%90, %c0_53, %c0_54] : memref<4x8x512xf32, #tpu.memory_space<vmem>>, vector<1x8x512xf32>
    %92 = vector.shape_cast %91 : vector<1x8x512xf32> to vector<8x512xf32>
    %c0_55 = arith.constant 0 : index
    %c0_56 = arith.constant 0 : index
    %93 = vector.load %arg8[%c0_55, %c0_56] : memref<8x128xf32, #tpu.memory_space<vmem>>, vector<8x128xf32>
    %c0_57 = arith.constant 0 : index
    %c0_58 = arith.constant 0 : index
    %94 = vector.load %arg3[%c0_57, %c0_58] : memref<128x512xf32, #tpu.memory_space<vmem>>, vector<128x512xf32>
    %cst_59 = arith.constant dense<0.000000e+00> : vector<8x512xf32>
    %95 = tpu.matmul %93, %94, %cst_59 {dimension_numbers = #tpu.dot_dimension_numbers<[1], [0], [0], [1], [0, 0, 1, 1], [], []>} : vector<8x128xf32>, vector<128x512xf32>, vector<8x512xf32> -> vector<8x512xf32>
    %96 = arith.addf %92, %95 : vector<8x512xf32>
    %97 = vector.extract_strided_slice %96 {offsets = [0, 0], sizes = [8, 384], strides = [1, 1]} : vector<8x512xf32> to vector<8x384xf32>
    %98 = arith.negf %97 : vector<8x384xf32>
    %99 = math.exp %98 : vector<8x384xf32>
    %cst_60 = arith.constant 1.000000e+00 : f32
    %100 = vector.broadcast %cst_60 : f32 to vector<8x384xf32>
    %101 = arith.addf %100, %99 : vector<8x384xf32>
    %102 = arith.divf %100, %101 : vector<8x384xf32>
    %103 = vector.extract_strided_slice %96 {offsets = [0, 384], sizes = [8, 128], strides = [1, 1]} : vector<8x512xf32> to vector<8x128xf32>
    %104 = math.tanh %103 : vector<8x128xf32>
    %105 = vector.extract_strided_slice %102 {offsets = [0, 0], sizes = [8, 128], strides = [1, 1]} : vector<8x384xf32> to vector<8x128xf32>
    %106 = vector.extract_strided_slice %102 {offsets = [0, 128], sizes = [8, 128], strides = [1, 1]} : vector<8x384xf32> to vector<8x128xf32>
    %107 = vector.extract_strided_slice %102 {offsets = [0, 256], sizes = [8, 128], strides = [1, 1]} : vector<8x384xf32> to vector<8x128xf32>
    %c0_61 = arith.constant 0 : index
    %c0_62 = arith.constant 0 : index
    %108 = vector.load %arg9[%c0_61, %c0_62] : memref<8x128xf32, #tpu.memory_space<vmem>>, vector<8x128xf32>
    %109 = arith.mulf %106, %108 : vector<8x128xf32>
    %110 = arith.mulf %105, %104 : vector<8x128xf32>
    %111 = arith.addf %109, %110 : vector<8x128xf32>
    %112 = math.tanh %111 : vector<8x128xf32>
    %113 = arith.mulf %107, %112 : vector<8x128xf32>
    %c0_63 = arith.constant 0 : index
    %c0_64 = arith.constant 0 : index
    %114 = vector.load %arg8[%c0_63, %c0_64] : memref<8x128xf32, #tpu.memory_space<vmem>>, vector<8x128xf32>
    tpu.vector_store %arg8[%c0_63, %c0_64], %113 {strides = array<i32>} : memref<8x128xf32, #tpu.memory_space<vmem>>, vector<8x128xf32>,
    %c0_65 = arith.constant 0 : index
    %c0_66 = arith.constant 0 : index
    %115 = vector.load %arg9[%c0_65, %c0_66] : memref<8x128xf32, #tpu.memory_space<vmem>>, vector<8x128xf32>
    tpu.vector_store %arg9[%c0_65, %c0_66], %111 {strides = array<i32>} : memref<8x128xf32, #tpu.memory_space<vmem>>, vector<8x128xf32>,
    %c4_i32 = arith.constant 4 : i32
    %c1_i32_67 = arith.constant 1 : i32
    %116 = arith.cmpi eq, %arg0, %c1_i32_67 : i32
    %117 = arith.extui %116 : i1 to i32
    %c0_i32_68 = arith.constant 0 : i32
    %118 = arith.cmpi ne, %117, %c0_i32_68 : i32
    scf.if %118 {
      %c0_69 = arith.constant 0 : index
      %c0_70 = arith.constant 0 : index
      %119 = vector.load %arg8[%c0_69, %c0_70] : memref<8x128xf32, #tpu.memory_space<vmem>>, vector<8x128xf32>
      %c0_71 = arith.constant 0 : index
      %c0_72 = arith.constant 0 : index
      %120 = vector.load %arg5[%c0_71, %c0_72] : memref<128x128xf32, #tpu.memory_space<vmem>>, vector<128x128xf32>
      %cst_73 = arith.constant dense<0.000000e+00> : vector<8x128xf32>
      %121 = tpu.matmul %119, %120, %cst_73 {dimension_numbers = #tpu.dot_dimension_numbers<[1], [0], [0], [1], [0, 0, 1, 1], [], []>} : vector<8x128xf32>, vector<128x128xf32>, vector<8x128xf32> -> vector<8x128xf32>
      %c0_74 = arith.constant 0 : index
      %c0_75 = arith.constant 0 : index
      %122 = vector.load %arg6[%c0_74, %c0_75] : memref<1x128xf32, #tpu.memory_space<vmem>>, vector<1x128xf32>
      %123 = vector.broadcast %122 : vector<1x128xf32> to vector<8x128xf32>
      %124 = arith.addf %121, %123 : vector<8x128xf32>
      %c0_76 = arith.constant 0 : index
      %c0_77 = arith.constant 0 : index
      %125 = vector.load %arg7[%c0_76, %c0_77] : memref<8x128xf32, #tpu.memory_space<vmem>>, vector<8x128xf32>
      tpu.vector_store %arg7[%c0_76, %c0_77], %124 {strides = array<i32>} : memref<8x128xf32, #tpu.memory_space<vmem>>, vector<8x128xf32>,
    } else {
    }
    return
  }
  func.func @transform_0(%arg0: i32) -> (i32, i32, i32) {
    %c0_i32 = arith.constant 0 : i32
    %c0_i32_0 = arith.constant 0 : i32
    %c0_i32_1 = arith.constant 0 : i32
    return %arg0, %c0_i32, %c0_i32_0 : i32, i32, i32
  }
  func.func @transform_1(%arg0: i32) -> (i32, i32) {
    %c0_i32 = arith.constant 0 : i32
    %c0_i32_0 = arith.constant 0 : i32
    %c0_i32_1 = arith.constant 0 : i32
    return %c0_i32, %c0_i32_0 : i32, i32
  }
  func.func @transform_2(%arg0: i32) -> (i32, i32) {
    %c0_i32 = arith.constant 0 : i32
    %c0_i32_0 = arith.constant 0 : i32
    %c0_i32_1 = arith.constant 0 : i32
    return %c0_i32, %c0_i32_0 : i32, i32
  }
  func.func @transform_3(%arg0: i32) -> (i32, i32) {
    %c0_i32 = arith.constant 0 : i32
    %c0_i32_0 = arith.constant 0 : i32
    %c0_i32_1 = arith.constant 0 : i32
    return %c0_i32, %c0_i32_0 : i32, i32
  }
  func.func @transform_4(%arg0: i32) -> (i32, i32) {
    %c0_i32 = arith.constant 0 : i32
    %c0_i32_0 = arith.constant 0 : i32
    %c0_i32_1 = arith.constant 0 : i32
    return %c0_i32, %c0_i32_0 : i32, i32
  }
  func.func @transform_5(%arg0: i32) -> (i32, i32) {
    %c0_i32 = arith.constant 0 : i32
    %c0_i32_0 = arith.constant 0 : i32
    %c0_i32_1 = arith.constant 0 : i32
    return %c0_i32, %c0_i32_0 : i32, i32
  }
  func.func @transform_6(%arg0: i32) -> (i32, i32) {
    %c0_i32 = arith.constant 0 : i32
    %c0_i32_0 = arith.constant 0 : i32
    %c0_i32_1 = arith.constant 0 : i32
    return %c0_i32, %c0_i32_0 : i32, i32
  }
}

</mosaic_0001>

<bundles_post_ra>
// kernel: tpu_custom_call.1
= control target key start
LH: loop header
LB: loop body
LE: loop exit
PB: predicated region body
PF: predicated region fallthrough
CT: control target
= control target key end

     0   :  { %11 = vsyncpa [#allocation6], 0  ;;  %s3000_s0 = inlined_call_operand.hbm [shape: f32[8,8,16], index: 0, kind: input, shape index: {}]   ;;  %s3001_s1 = inlined_call_operand.hbm [shape: f32[16,512], index: 1, kind: input, shape index: {}]   ;;  %s3002_s2 = inlined_call_operand.hbm [shape: f32[128,512], index: 2, kind: input, shape index: {}]   ;;  %s3003_s3 = inlined_call_operand.vmem [shape: f32[1,512], index: 3, kind: input, shape index: {}]   ;;  %s3004_s4 = inlined_call_operand.hbm [shape: f32[128,128], index: 4, kind: input, shape index: {}]   ;;  %s3005_s5 = inlined_call_operand.vmem [shape: f32[1,128], index: 5, kind: input, shape index: {}]   ;;  %s3006_s6 = inlined_call_operand.hbm [shape: f32[8,128], index: 6, kind: output, shape index: {}]  }
   0x1   :  { %13 = vsyncpa [#allocation6 + $0x1], 0 }
   0x2   :  { %14 = vsyncpa [#allocation9], 0 }
   0x3   :  { %15 = vsyncpa [#allocation12], 0 }
   0x4   :  { %16 = vsyncpa [#allocation7], 0  ;;  %s2507_s21 = smov 0   ;;  %s2509_s22 = smov 0  }
   0x5   :  { %s2511_s23 = smov 0   ;;  %s2513_s24 = smov 0  }
   0x6 LB: > { %s2526_s25 = sadd.s32 4294967295, %s2456_s24   ;;  %p42_p0 = scmp.ne.s32.totalorder %s2448_s22, %s2444_s21  ;;  %s2456_s24 = sphi %s2513_s24, %s3025_s24   ;;  %s2452_s23 = sphi %s2511_s23, %s3024_s23   ;;  %s2448_s22 = sphi %s2509_s22, %s3023_s22   ;;  %s2444_s21 = sphi %s2507_s21, %s3022_s21  }
   0x7   : > { %p3007_p1 = scmp.eq.s32.totalorder %s2526_s25, 0  ;;  %p1707_p2 = scmp.ge.s32.totalorder %s2456_s24, 1 }
   0x8   : > { %p179_p3 = scmp.lt.s32.totalorder %s2456_s24, 3  ;;  %s2458_s28 = smov [#allocation8]  }
   0x9   : > { %p2535_p5 = por %p3007_p1, %p42_p0  ;;  %s191_s29 = sshll.u32 %s2458_s28, 4  ;;  %s2543_s29 = int_to_ptr.vmem [resolvable:$true] %s191_s29 }
   0xa   : > { %p2539_p6 = pnand %p1707_p2, %p179_p3  ;;  %s2459_s7 = smov [#allocation10]  }
   0xb   : > { %s3010_s26 = scalar_select %p2535_p5, 1, 0 }
   0xc   : > { %s3011_s27 = scalar_select %p2539_p6, 1, 0 }
   0xd   : > { %p2138_p7 = pneg %p2539_p6  ;;  %s204_s8 = sshll.u32 %s2459_s7, 4  ;;  %s2553_s8 = int_to_ptr.vmem [resolvable:$true] %s204_s8 }
   0xe   : > { %s2460_s9 = smov [#allocation11]   ;;  %s2270_s13 = scalar_lea.hbm %s3001_s1, 1024 }
   0xf   : > { %p2549_p8 = pnand %p2138_p7, %p3007_p1  ;;  %s2555_s10 = sshll.u32 %s2460_s9, 4  ;;  %s221_s10 = int_to_ptr.vmem [resolvable:$true] %s2555_s10 }
  0x10   : > { %p2271_p9 = scmp.ne.s32.totalorder %s3001_s1, %s2270_s13  ;;  %p2277_p13 = scmp.lt.u32.totalorder %s2270_s13, %s3001_s1 }
  0x11   : > { %p2565_p10 = pneg %p2549_p8 }
  0x13   : > { %p2273_p11 = pnand %p2565_p10, %p2271_p9 }
  0x15   : > { %p2274_p12 = pneg %p2273_p11 }
  0x17   : > { %p2279_p0 = pnand %p2277_p13, %p2274_p12 }
  0x19   : > { %2282 = shalt.err (!%p2279_p0)
}
  0x1a   : > { %s2283_s19 = scalar_lea.vmem %s2543_s29, 1024  ;;  %p2291_p4 = scmp.lt.s32.totalorder %s2543_s29, %s2543_s29 }
  0x1b   : > { %p2284_p2 = scmp.ne.s32.totalorder %s2543_s29, %s2283_s19  ;;  %p2292_p1 = scmp.lt.s32.totalorder %s2283_s19, %s2283_s19 }
  0x1d   : > { %p2286_p3 = pnand %p2284_p2, %p2565_p10  ;;  %p2293_p9 = por %p2292_p1, %p2291_p4 }
  0x1f   : > { %p2287_p7 = pneg %p2286_p3 }
  0x21   : > { %p2294_p11 = pnand %p2293_p9, %p2287_p7 }
  0x23   : > { %2297 = shalt.err (!%p2294_p11)
}
  0x24   : > { %s2461_s20 = smov 512   ;;  %s2462_s21 = smov 32  }
  0x25   : > { %2141 = dma.hbm_to_vmem [thread:$0]  (!%p2549_p8), %s3001_s1, 1024, %s2543_s29, [#allocation9], %s2461_s20, %s2461_s20, %s2462_s21  }
  0x26   : > { %s2298_s12 = scalar_lea.hbm %s3002_s2, 8192 }
  0x27   : > { %p2299_p1 = scmp.ne.s32.totalorder %s3002_s2, %s2298_s12  ;;  %p2305_p13 = scmp.lt.u32.totalorder %s2298_s12, %s3002_s2 }
  0x29   : > { %p2301_p4 = pnand %p2299_p1, %p2565_p10 }
  0x2b   : > { %p2302_p12 = pneg %p2301_p4 }
  0x2d   : > { %p2307_p0 = pnand %p2305_p13, %p2302_p12 }
  0x2f   : > { %2310 = shalt.err (!%p2307_p0)
}
  0x30   : > { %s2311_s29 = scalar_lea.vmem %s2553_s8, 8192  ;;  %p2319_p9 = scmp.lt.s32.totalorder %s2553_s8, %s2553_s8 }
  0x31   : > { %p2312_p2 = scmp.ne.s32.totalorder %s2553_s8, %s2311_s29  ;;  %p2320_p11 = scmp.lt.s32.totalorder %s2311_s29, %s2311_s29 }
  0x33   : > { %p2314_p3 = pnand %p2312_p2, %p2565_p10  ;;  %p2321_p1 = por %p2320_p11, %p2319_p9 }
  0x35   : > { %p2315_p7 = pneg %p2314_p3 }
  0x37   : > { %p2322_p4 = pnand %p2321_p1, %p2315_p7 }
  0x39   : > { %2325 = shalt.err (!%p2322_p4)
}
  0x3a   : > { %2144 = dma.hbm_to_vmem [thread:$0]  (!%p2549_p8), %s3002_s2, 8192, %s2553_s8, [#allocation9], %s2461_s20, %s2461_s20, %s2462_s21  }
  0x3b   : > { %s2326_s9 = scalar_lea.hbm %s3004_s4, 2048 }
  0x3c   : > { %p2327_p12 = scmp.ne.s32.totalorder %s3004_s4, %s2326_s9  ;;  %p2333_p2 = scmp.lt.u32.totalorder %s2326_s9, %s3004_s4 }
  0x3e   : > { %p2329_p13 = pnand %p2327_p12, %p2565_p10 }
  0x40   : > { %p2330_p0 = pneg %p2329_p13 }
  0x42   : > { %p2335_p3 = pnand %p2333_p2, %p2330_p0 }
  0x44   : > { %2338 = shalt.err (!%p2335_p3)
}
  0x45   : > { %s2339_s15 = scalar_lea.vmem %s221_s10, 2048  ;;  %p2347_p1 = scmp.lt.s32.totalorder %s221_s10, %s221_s10 }
  0x46   : > { %p2340_p7 = scmp.ne.s32.totalorder %s221_s10, %s2339_s15  ;;  %p2348_p4 = scmp.lt.s32.totalorder %s2339_s15, %s2339_s15 }
  0x48   : > { %p2342_p9 = pnand %p2340_p7, %p2565_p10  ;;  %p2349_p5 = por %p2348_p4, %p2347_p1 }
  0x4a   : > { %p2343_p11 = pneg %p2342_p9 }
  0x4c   : > { %p2350_p6 = pnand %p2349_p5, %p2343_p11 }
  0x4e   : > { %2353 = shalt.err (!%p2350_p6)
}
  0x4f   : > { %s2463_s8 = smov 128   ;;  %s2464_s16 = smov 8  }
  0x50   : > { %2147 = dma.hbm_to_vmem [thread:$0]  (!%p2549_p8), %s3004_s4, 2048, %s221_s10, [#allocation12], %s2463_s8, %s2463_s8, %s2464_s16  }
  0x51   : > { %s2632_s17 = sadd.s32 1, %s2456_s24   ;;  %s29_s18 = sadd.s32 1, %s2452_s23 }
  0x52   : > { %s26_s29 = ssub.s32 %s2456_s24, %s2632_s17  ;;  %p36_p6 = scmp.ne.s32.totalorder %s2452_s23, %s2448_s22 }
  0x53   : > { %p27_p5 = scmp.eq.s32.totalorder %s26_s29, 0  ;;  %p37_p10 = scmp.eq.s32.totalorder %s2456_s24, 0 }
  0x54   : > { %p2155_p12 = scmp.lt.s32.totalorder %s2456_s24, 2  ;;  %s237_s30 = sand.u32 1, %s2452_s23  }
  0x55   : > { %s2642_s19 = scalar_select %p27_p5, %s2452_s23, %s29_s18  }
  0x56   : > { %p38_p13 = por %p37_p10, %p36_p6  ;;  %s1712_s28 = sshll.u32 %s237_s30, 5 }
  0x57   : > { %s1747_s7 = sshll.u32 %s2456_s24, 9  ;;  %s241_s10 = scalar_lea.vmem [#allocation5], %s1712_s28 }
  0x58   : > { %s2649_s12 = scalar_lea.hbm %s3000_s0, %s1747_s7  ;;  %s248_s13 = sshll.u32 %s241_s10, 4  ;;  %s2651_s13 = int_to_ptr.vmem [resolvable:$true] %s248_s13 }
  0x59   : > { %p2653_p8 = pnand %p2155_p12, %p38_p13  ;;  %s2657_s24 = scalar_lea.sflag [#allocation6], %s237_s30 }
  0x5a   : > { %s2354_s15 = scalar_lea.hbm %s2649_s12, 512  ;;  %s2359_s29 = scalar_lea.hbm %s3000_s0, 1024 }
  0x5b   : > { %p2355_p0 = scmp.ne.s32.totalorder %s2649_s12, %s2354_s15  ;;  %p2356_p2 = pneg %p2653_p8 }
  0x5c   : > { %p2360_p9 = scmp.lt.u32.totalorder %s2649_s12, %s3000_s0  ;;  %p2361_p11 = scmp.lt.u32.totalorder %s2359_s29, %s2354_s15 }
  0x5d   : > { %p2357_p3 = pnand %p2356_p2, %p2355_p0  ;;  %p2363_p4 = scmp.lt.u32.totalorder %s2354_s15, %s2649_s12 }
  0x5e   : > { %p2362_p1 = por %p2361_p11, %p2360_p9 }
  0x5f   : > { %p2358_p7 = pneg %p2357_p3 }
  0x60   : > { %p2364_p5 = por %p2363_p4, %p2362_p1 }
  0x62   : > { %p2365_p6 = pnand %p2364_p5, %p2358_p7 }
  0x64   : > { %2368 = shalt.err (!%p2365_p6)
}
  0x65   : > { %s2369_s30 = scalar_lea.vmem %s2651_s13, 512  ;;  %s2465_s7 = smov [#allocation5]  }
  0x66   : > { %p2370_p10 = scmp.ne.s32.totalorder %s2651_s13, %s2369_s30  ;;  %s2374_s9 = sshll.u32 %s2465_s7, 4  ;;  %s2375_s9 = int_to_ptr.vmem [resolvable:$false] %s2374_s9 }
  0x67   : > { %s2376_s11 = scalar_lea.vmem %s2375_s9, 1024  ;;  %p2377_p0 = scmp.lt.s32.totalorder %s2651_s13, %s2375_s9 }
  0x68   : > { %p2372_p12 = pnand %p2370_p10, %p2356_p2  ;;  %p2378_p3 = scmp.lt.s32.totalorder %s2376_s11, %s2369_s30 }
  0x6a   : > { %p2373_p13 = pneg %p2372_p12  ;;  %p2379_p9 = por %p2378_p3, %p2377_p0 }
  0x6c   : > { %p2380_p11 = pnand %p2379_p9, %p2373_p13 }
  0x6e   : > { %2383 = shalt.err (!%p2380_p11)
}
  0x6f   : > { %2151 = dma.hbm_to_vmem [thread:$0]  (!%p2653_p8), %s2649_s12, 512, %s2651_s13, %s2657_s24, %s2463_s8, %s2463_s8, %s2464_s16  }
  0x70   : > { %p3015_p2 = scmp.ne.s32.totalorder %s3011_s27, 0 }
  0x71   : > { %s262_s10 = sand.u32 (!%p3015_p2), 1, %s2448_s22   ;;  %p3016_p7 = scmp.ne.s32.totalorder (!%p3015_p2), %s3010_s26, 0 }
  0x72   : > { %260 = sbr.rel (%p3015_p2) target bundleno = 1457 (0x5b1), region = 44  ;;  %s1716_s15 = sshll.u32 (!%p3015_p2), %s262_s10, 5 }
  0x73   : > { %s263_s20 = scalar_lea.sflag (!%p3015_p2), [#allocation6], %s262_s10  ;;  %s2691_s21 = scalar_lea.vmem (!%p3015_p2), [#allocation5], %s1716_s15 }
  0x79   : > { %2427 = dma.done.wait (%p3016_p7), %s263_s20, 512  }
  0x7a   : > { %2429 = vsyncadd (%p3016_p7), %s263_s20, 4294966784  ;;  %p3017_p1 = scmp.eq.s32.totalorder %s2526_s25, 0 }
  0x7c   : > { %2431 = dma.done.wait (%p3017_p1), [#allocation9], 9216   ;;  %p3018_p8 = pmov %p3017_p1 }
  0x7d   : > { %p3019_p4 = pmov %p3017_p1 }
  0x7e   : > { %2433 = vsyncadd (%p3018_p8), [#allocation9], 4294958080 }
  0x7f   : > { %2435 = dma.done.wait (%p3019_p4), [#allocation12], 2048   ;;  %p3020_p5 = pmov %p3017_p1 }
  0x80   : > { %p3021_p6 = scmp.ne.s32.totalorder %s2526_s25, 0 }
  0x81   : > { %2437 = vsyncadd (%p3020_p5), [#allocation12], 4294965248  ;;  %v2466_v0 = vmov (!%p3021_p6), 0.0  }
  0x82   : > { %306 = sbr.rel (%p3021_p6) target bundleno = 137 (0x89), region = 64  ;;  %307 = vst [vmem:[#allocation2] sm:$0xff] (!%p3021_p6), %v2466_v0  ;;  %308 = vst [vmem:[#allocation3] sm:$0xff] (!%p3021_p6), %v2466_v0 }
  0x89 PF: > { %v314_v1 = vld [vmem:[#allocation8 + $0x8] sm:$0xff]  ;;  %v316_v3 = vld [vmem:[#allocation8 + $0x18] sm:$0xff]  ;;  %v313_v6 = vld [vmem:[#allocation8] sm:$0xff]  ;;  %v2467_v8 = vmov 0.0   ;;  %vm343_vm0 = vcmask 130048   ;;  %p1741_p10 = scmp.ne.s32.totalorder %s2526_s25, 1 }
  0x8a   : > { %v318_v2 = vld [vmem:[#allocation8 + $0x28] sm:$0xff]  ;;  %v320_v5 = vld [vmem:[#allocation8 + $0x38] sm:$0xff]  ;;  %v317_v7 = vld [vmem:[#allocation8 + $0x20] sm:$0xff]  ;;  %420 = vmatprep.mubr.f32.mxu0 %v2467_v8  ;;  %509 = vmatprep.mubr.f32.mxu1 %v2467_v8  ;;  %vm2469_vm1 = vmmov (!%p1741_p10), 0  }
  0x8b   : > { %v1800_v4 = vpack.c.bf16 %v318_v2, %v314_v1  ;;  %v1804_v9 = vpack.c.bf16 %v320_v5, %v316_v3  ;;  %v1802_v10 = vpack.c.bf16 %v317_v7, %v313_v6  ;;  %v315_v11 = vld [vmem:[#allocation8 + $0x10] sm:$0xff]  ;;  %v556_v13 = vld [vmem:[#allocation10 + $0x8] sm:$0xff]  ;;  %v558_v16 = vld [vmem:[#allocation10 + $0x18] sm:$0xff] }
  0x8c   : > { %v319_v12 = vld [vmem:[#allocation8 + $0x30] sm:$0xff]  ;;  %v560_v15 = vld [vmem:[#allocation10 + $0x28] sm:$0xff]  ;;  %v562_v17 = vld [vmem:[#allocation10 + $0x38] sm:$0xff] }
  0x8d   : > { %1801 = vmatprep.subr.bf16.mxu0 %v1800_v4  ;;  %v1806_v14 = vpack.c.bf16 %v319_v12, %v315_v11  ;;  %1805 = vmatprep.subr.bf16.mxu1 %v1804_v9  ;;  %v2709_v18 = vpack.c.bf16 %v560_v15, %v556_v13  ;;  %v2711_v19 = vpack.c.bf16 %v562_v17, %v558_v16  ;;  %v309_v20 = vld [vmem:[%s2691_s21] sm:$0xff]  ;;  %v557_v24 = vld [vmem:[#allocation10 + $0x10] sm:$0xff]  ;;  %v564_v26 = vld [vmem:[#allocation10 + $0x48] sm:$0xff] }
  0x8e   : > { %1803 = vmatpush1.bf16.msra.mxu0 %v1802_v10  ;;  %v555_v21 = vld [vmem:[#allocation10] sm:$0xff]  ;;  %v561_v25 = vld [vmem:[#allocation10 + $0x30] sm:$0xff]  ;;  %v568_v28 = vld [vmem:[#allocation10 + $0x68] sm:$0xff] }
  0x8f   : > { %v559_v22 = vld [vmem:[#allocation10 + $0x20] sm:$0xff]  ;;  %1807 = vmatpush1.bf16.msra.mxu1 %v1806_v14  ;;  %1809 = vmatprep.subr.bf16.mxu0 %v2709_v18  ;;  %v2718_v27 = vpack.c.bf16 %v561_v25, %v557_v24  ;;  %v566_v29 = vld [vmem:[#allocation10 + $0x58] sm:$0xff]  ;;  %v2721_v31 = vpack.c.bf16 %v568_v28, %v564_v26  ;;  %v565_v35 = vld [vmem:[#allocation10 + $0x50] sm:$0xff] }
  0x90   : > { %v2714_v23 = vpack.c.bf16 %v559_v22, %v555_v21  ;;  %1841 = vmatprep.subr.bf16.mxu1 %v2711_v19  ;;  %v570_v30 = vld [vmem:[#allocation10 + $0x78] sm:$0xff]  ;;  %v563_v33 = vld [vmem:[#allocation10 + $0x40] sm:$0xff]  ;;  %v569_v37 = vld [vmem:[#allocation10 + $0x70] sm:$0xff] }
  0x91   : > { %1721 = vmatmul.mubr.msk.f32.vlgmr.msra.gmra.mrb[0].mxu0 %vm343_vm0, %v309_v20  ;;  %v2723_v32 = vpack.c.bf16 %v570_v30, %v566_v29  ;;  %v567_v34 = vld [vmem:[#allocation10 + $0x60] sm:$0xff]  ;;  %v572_v38 = vld [vmem:[#allocation10 + $0x88] sm:$0xff]  ;;  %v2731_v40 = vpack.c.bf16 %v569_v37, %v565_v35  ;;  %v574_v42 = vld [vmem:[#allocation10 + $0x98] sm:$0xff] }
  0x92   : > { %1725 = vmatmul.mubr.msk.f32.vlgmr.msra.gmra.mrb[0].mxu1 %vm343_vm0, %v309_v20  ;;  %1811 = vmatpush1.bf16.msra.mxu0 %v2714_v23  ;;  %v2727_v36 = vpack.c.bf16 %v567_v34, %v563_v33  ;;  %v576_v39 = vld [vmem:[#allocation10 + $0xa8] sm:$0xff]  ;;  %v578_v43 = vld [vmem:[#allocation10 + $0xb8] sm:$0xff]  ;;  %v571_v44 = vld [vmem:[#allocation10 + $0x80] sm:$0xff] }
  0x93   : > { %1843 = vmatpush1.bf16.msra.mxu1 %v2718_v27  ;;  %1813 = vmatprep.subr.bf16.mxu0 %v2721_v31  ;;  %v2733_v41 = vpack.c.bf16 %v576_v39, %v572_v38  ;;  %v2736_v45 = vpack.c.bf16 %v578_v43, %v574_v42  ;;  %v575_v46 = vld [vmem:[#allocation10 + $0xa0] sm:$0xff]  ;;  %v573_v47 = vld [vmem:[#allocation10 + $0x90] sm:$0xff]  ;;  %v580_v49 = vld [vmem:[#allocation10 + $0xc8] sm:$0xff] }
  0x94   : > { %1845 = vmatprep.subr.bf16.mxu1 %v2723_v32  ;;  %v577_v48 = vld [vmem:[#allocation10 + $0xb0] sm:$0xff]  ;;  %426 = vmatprep.mubr.f32.mxu0 %v2467_v8  ;;  %v584_v50 = vld [vmem:[#allocation10 + $0xe8] sm:$0xff]  ;;  %v582_v51 = vld [vmem:[#allocation10 + $0xd8] sm:$0xff]  ;;  %v2741_v52 = vpack.c.bf16 %v575_v46, %v571_v44 }
  0x95   : > { %515 = vmatprep.mubr.f32.mxu1 %v2467_v8  ;;  %v586_v53 = vld [vmem:[#allocation10 + $0xf8] sm:$0xff]  ;;  %v2745_v54 = vpack.c.bf16 %v577_v48, %v573_v47  ;;  %v2747_v55 = vpack.c.bf16 %v584_v50, %v580_v49  ;;  %v579_v56 = vld [vmem:[#allocation10 + $0xc0] sm:$0xff]  ;;  %v581_v58 = vld [vmem:[#allocation10 + $0xd0] sm:$0xff] }
  0x96   : > { %1815 = vmatpush1.bf16.msra.mxu0 %v2727_v36  ;;  %v583_v57 = vld [vmem:[#allocation10 + $0xe0] sm:$0xff]  ;;  %v2750_v59 = vpack.c.bf16 %v586_v53, %v582_v51  ;;  %v585_v60 = vld [vmem:[#allocation10 + $0xf0] sm:$0xff]  ;;  %v588_v61 = vld [vmem:[#allocation10 + $0x108] sm:$0xff] }
  0x97   : > { %1847 = vmatpush1.bf16.msra.mxu1 %v2731_v40  ;;  %1817 = vmatprep.subr.bf16.mxu0 %v2733_v41  ;;  %v592_v62 = vld [vmem:[#allocation10 + $0x128] sm:$0xff]  ;;  %v590_v63 = vld [vmem:[#allocation10 + $0x118] sm:$0xff]  ;;  %v2753_v1 = vpack.c.bf16 %v583_v57, %v579_v56  ;;  %v2758_v3 = vpack.c.bf16 %v585_v60, %v581_v58  ;;  %v587_v5 = vld [vmem:[#allocation10 + $0x100] sm:$0xff] }
  0x98   : > { %1849 = vmatprep.subr.bf16.mxu1 %v2736_v45  ;;  %v594_v0 = vld [vmem:[#allocation10 + $0x138] sm:$0xff]  ;;  %v310_v2 = vld [vmem:[%s2691_s21 + $0x8] sm:$0xff]  ;;  %v2760_v4 = vpack.c.bf16 %v592_v62, %v588_v61  ;;  %v591_v6 = vld [vmem:[#allocation10 + $0x120] sm:$0xff] }
  0x99   : > { %v589_v7 = vld [vmem:[#allocation10 + $0x110] sm:$0xff]  ;;  %v2763_v9 = vpack.c.bf16 %v594_v0, %v590_v63  ;;  %1722 = vmatmul.mubr.msk.f32.gmra.mrb[2].mxu0 %vm343_vm0, %v310_v2  ;;  %v596_v11 = vld [vmem:[#allocation10 + $0x148] sm:$0xff]  ;;  %1726 = vmatmul.mubr.msk.f32.gmra.mrb[2].mxu1 %vm343_vm0, %v310_v2  ;;  %v598_v13 = vld [vmem:[#allocation10 + $0x158] sm:$0xff]  ;;  %v2770_v16 = vpack.c.bf16 %v591_v6, %v587_v5  ;;  %v323_v5 = vlaneseq }
  0x9a   : > { %1819 = vmatpush1.bf16.msra.mxu0 %v2741_v52  ;;  %v593_v10 = vld [vmem:[#allocation10 + $0x130] sm:$0xff]  ;;  %v600_v12 = vld [vmem:[#allocation10 + $0x168] sm:$0xff]  ;;  %v602_v14 = vld [vmem:[#allocation10 + $0x178] sm:$0xff]  ;;  %432 = vmatprep.mubr.f32.mxu0 %v2467_v8 }
  0x9b   : > { %1851 = vmatpush1.bf16.msra.mxu1 %v2745_v54  ;;  %1821 = vmatprep.subr.bf16.mxu0 %v2747_v55  ;;  %v311_v15 = vld [vmem:[%s2691_s21 + $0x10] sm:$0xff]  ;;  %v2775_v17 = vpack.c.bf16 %v593_v10, %v589_v7  ;;  %v2777_v20 = vpack.c.bf16 %v600_v12, %v596_v11  ;;  %v595_v21 = vld [vmem:[#allocation10 + $0x140] sm:$0xff]  ;;  %v2780_v25 = vpack.c.bf16 %v602_v14, %v598_v13  ;;  %v604_v28 = vld [vmem:[#allocation10 + $0x188] sm:$0xff]  ;;  %v324_v6 = vshrl.u32 %v323_v5, 7 }
  0x9c   : > { %1853 = vmatprep.subr.bf16.mxu1 %v2750_v59  ;;  %521 = vmatprep.mubr.f32.mxu1 %v2467_v8  ;;  %v599_v22 = vld [vmem:[#allocation10 + $0x160] sm:$0xff]  ;;  %v597_v24 = vld [vmem:[#allocation10 + $0x150] sm:$0xff]  ;;  %v608_v29 = vld [vmem:[#allocation10 + $0x1a8] sm:$0xff] }
  0x9d   : > { %v601_v26 = vld [vmem:[#allocation10 + $0x170] sm:$0xff]  ;;  %1723 = vmatmul.mubr.msk.f32.gmra.mrb[4].mxu0 %vm343_vm0, %v311_v15  ;;  %1727 = vmatmul.mubr.msk.f32.gmra.mrb[4].mxu1 %vm343_vm0, %v311_v15  ;;  %v606_v30 = vld [vmem:[#allocation10 + $0x198] sm:$0xff]  ;;  %v2787_v35 = vpack.c.bf16 %v599_v22, %v595_v21  ;;  %v2794_v38 = vpack.c.bf16 %v608_v29, %v604_v28  ;;  %v603_v39 = vld [vmem:[#allocation10 + $0x180] sm:$0xff]  ;;  %v325_v7 = vsub.s32 0, %v324_v6  ;;  %v329_v11 = vsub.s32 1, %v324_v6 }
  0x9e   : > { %1823 = vmatpush1.bf16.msra.mxu0 %v2753_v1  ;;  %v610_v33 = vld [vmem:[#allocation10 + $0x1b8] sm:$0xff]  ;;  %438 = vmatprep.mubr.f32.mxu0 %v2467_v8  ;;  %v2792_v37 = vpack.c.bf16 %v601_v26, %v597_v24  ;;  %v607_v42 = vld [vmem:[#allocation10 + $0x1a0] sm:$0xff]  ;;  %v605_v43 = vld [vmem:[#allocation10 + $0x190] sm:$0xff]  ;;  %v333_v15 = vsub.s32 2, %v324_v6 }
  0x9f   : > { %1855 = vmatpush1.bf16.msra.mxu1 %v2758_v3  ;;  %1825 = vmatprep.subr.bf16.mxu0 %v2760_v4  ;;  %v312_v34 = vld [vmem:[%s2691_s21 + $0x18] sm:$0xff]  ;;  %v2797_v44 = vpack.c.bf16 %v610_v33, %v606_v30  ;;  %v609_v46 = vld [vmem:[#allocation10 + $0x1b0] sm:$0xff]  ;;  %v612_v47 = vld [vmem:[#allocation10 + $0x1c8] sm:$0xff]  ;;  %v2803_v51 = vpack.c.bf16 %v607_v42, %v603_v39  ;;  %v337_v30 = vsub.s32 3, %v324_v6 }
  0xa0   : > { %1857 = vmatprep.subr.bf16.mxu1 %v2763_v9  ;;  %527 = vmatprep.mubr.f32.mxu1 %v2467_v8  ;;  %v616_v48 = vld [vmem:[#allocation10 + $0x1e8] sm:$0xff]  ;;  %v614_v49 = vld [vmem:[#allocation10 + $0x1d8] sm:$0xff]  ;;  %v2808_v53 = vpack.c.bf16 %v609_v46, %v605_v43  ;;  %v611_v57 = vld [vmem:[#allocation10 + $0x1c0] sm:$0xff] }
  0xa1   : > { %1724 = vmatmul.mubr.msk.f32.gmra.mrb[6].mxu0 %vm343_vm0, %v312_v34  ;;  %1728 = vmatmul.mubr.msk.f32.gmra.mrb[6].mxu1 %vm343_vm0, %v312_v34  ;;  %v618_v50 = vld [vmem:[#allocation10 + $0x1f8] sm:$0xff]  ;;  %v2810_v56 = vpack.c.bf16 %v616_v48, %v612_v47  ;;  %v615_v58 = vld [vmem:[#allocation10 + $0x1e0] sm:$0xff]  ;;  %v613_v61 = vld [vmem:[#allocation10 + $0x1d0] sm:$0xff] }
  0xa2   : > { %1827 = vmatpush1.bf16.msra.mxu0 %v2770_v16  ;;  %683 = vmatprep.mubr.f32.mxu0 %v2467_v8  ;;  %v2813_v60 = vpack.c.bf16 %v618_v50, %v614_v49  ;;  %v617_v62 = vld [vmem:[#allocation10 + $0x1f0] sm:$0xff]  ;;  %v2816_v63 = vpack.c.bf16 %v615_v58, %v611_v57  ;;  %v784_v58 = vld [vmem:[#allocation3] sm:$0xff] }
  0xa3   : > { %1859 = vmatpush1.bf16.msra.mxu1 %v2775_v17  ;;  %1829 = vmatprep.subr.bf16.mxu0 %v2777_v20  ;;  %v2820_v0 = vpack.c.bf16 %v617_v62, %v613_v61  ;;  %v554_v2 = vld [vmem:[#allocation2] sm:$0xff] }
  0xa4   : > { %1861 = vmatprep.subr.bf16.mxu1 %v2780_v25  ;;  %754 = vmatprep.mubr.f32.mxu1 %v2467_v8  ;;  %v321_v10 = vld [vmem:[%s3003_s3] sm:$0xf] }
  0xa5   : > { %v2864_v12 = vrot.slane %v321_v10, %v325_v7  ;;  %v2866_v13 = vrot.slane %v321_v10, %v329_v11  ;;  %v2870_v28 = vrot.slane %v321_v10, %v333_v15  ;;  %v2873_v34 = vrot.slane %v321_v10, %v337_v30 }
  0xa6   : > { %1831 = vmatpush1.bf16.msra.mxu0 %v2787_v35 }
  0xa7   : > { %1863 = vmatpush1.bf16.msra.mxu1 %v2792_v37  ;;  %1833 = vmatprep.subr.bf16.mxu0 %v2794_v38 }
  0xa8   : > { %1865 = vmatprep.subr.bf16.mxu1 %v2797_v44 }
  0xaa   : > { %1835 = vmatpush1.bf16.msra.mxu0 %v2803_v51 }
  0xab   : > { %1867 = vmatpush1.bf16.msra.mxu1 %v2808_v53  ;;  %1837 = vmatprep.subr.bf16.mxu0 %v2810_v56 }
  0xac   : > { %1869 = vmatprep.subr.bf16.mxu1 %v2813_v60 }
  0xae   : > { %1839 = vmatpush1.bf16.msra.mxu0 %v2816_v63 }
  0xaf   : > { %1871 = vmatpush1.bf16.msra.mxu1 %v2820_v0  ;;  %1873 = vmatprep.subr.bf16.mxu0 %v2709_v18 }
  0xb0   : > { %1905 = vmatprep.subr.bf16.mxu1 %v2711_v19 }
  0xb1   : > { %684 = vmatmul.mubr.f32.vlgmr.msra.gmra.mrb[0].mxu0 %v554_v2 }
  0xb2   : > { %755 = vmatmul.mubr.f32.vlgmr.msra.gmra.mrb[0].mxu1 %v554_v2  ;;  %1875 = vmatpush1.bf16.msra.mxu0 %v2714_v23 }
  0xb3   : > { %1907 = vmatpush1.bf16.msra.mxu1 %v2718_v27  ;;  %1877 = vmatprep.subr.bf16.mxu0 %v2721_v31 }
  0xb4   : > { %1909 = vmatprep.subr.bf16.mxu1 %v2723_v32  ;;  %926 = vmatprep.mubr.f32.mxu0 %v2467_v8 }
  0xb5   : > { %997 = vmatprep.mubr.f32.mxu1 %v2467_v8 }
  0xb6   : > { %1879 = vmatpush1.bf16.msra.mxu0 %v2727_v36 }
  0xb7   : > { %1911 = vmatpush1.bf16.msra.mxu1 %v2731_v40  ;;  %1881 = vmatprep.subr.bf16.mxu0 %v2733_v41 }
  0xb8   : > { %1913 = vmatprep.subr.bf16.mxu1 %v2736_v45 }
  0xba   : > { %1883 = vmatpush1.bf16.msra.mxu0 %v2741_v52 }
  0xbb   : > { %1915 = vmatpush1.bf16.msra.mxu1 %v2745_v54  ;;  %1885 = vmatprep.subr.bf16.mxu0 %v2747_v55 }
  0xbc   : > { %1917 = vmatprep.subr.bf16.mxu1 %v2750_v59 }
  0xbe   : > { %1887 = vmatpush1.bf16.msra.mxu0 %v2753_v1 }
  0xbf   : > { %1919 = vmatpush1.bf16.msra.mxu1 %v2758_v3  ;;  %1889 = vmatprep.subr.bf16.mxu0 %v2760_v4 }
  0xc0   : > { %1921 = vmatprep.subr.bf16.mxu1 %v2763_v9 }
  0xc2   : > { %1891 = vmatpush1.bf16.msra.mxu0 %v2770_v16 }
  0xc3   : > { %1923 = vmatpush1.bf16.msra.mxu1 %v2775_v17  ;;  %1893 = vmatprep.subr.bf16.mxu0 %v2777_v20 }
  0xc4   : > { %1925 = vmatprep.subr.bf16.mxu1 %v2780_v25 }
  0xc6   : > { %1895 = vmatpush1.bf16.msra.mxu0 %v2787_v35 }
  0xc7   : > { %1927 = vmatpush1.bf16.msra.mxu1 %v2792_v37  ;;  %1897 = vmatprep.subr.bf16.mxu0 %v2794_v38 }
  0xc8   : > { %1929 = vmatprep.subr.bf16.mxu1 %v2797_v44 }
  0xca   : > { %1899 = vmatpush1.bf16.msra.mxu0 %v2803_v51 }
  0xcb   : > { %1931 = vmatpush1.bf16.msra.mxu1 %v2808_v53  ;;  %1901 = vmatprep.subr.bf16.mxu0 %v2810_v56 }
  0xcc   : > { %1933 = vmatprep.subr.bf16.mxu1 %v2813_v60 }
  0xce   : > { %1903 = vmatpush1.bf16.msra.mxu0 %v2816_v63 }
  0xcf   : > { %1935 = vmatpush1.bf16.msra.mxu1 %v2820_v0  ;;  %1937 = vmatprep.subr.bf16.mxu0 %v2709_v18 }
  0xd0   : > { %1969 = vmatprep.subr.bf16.mxu1 %v2711_v19 }
 0x184   : > { %v685_v14 = vpop.f32.mrb[0].mxu0 }
 0x185   : > { %v2088_v21 = vadd.f32 %v685_v14, %v2864_v12  ;;  %v756_v22 = vpop.f32.mrb[0].mxu1  ;;  %v687_v18 = vpop.f32.mrb[1].mxu0 }
 0x186   : > { %v2089_v19 = vadd.f32 %v687_v18, %v2866_v13  ;;  %v758_v24 = vpop.f32.mrb[1].mxu1  ;;  %v2096_v33 = vadd.f32 %v756_v22, %v2870_v28 }
 0x187   : > { %v1729_v26 = vmul.f32 -1.442695, %v2088_v21  ;;  %v2097_v42 = vadd.f32 %v758_v24, %v2873_v34 }
 0x188   : > { %v1730_v29 = vmul.f32 -1.442695, %v2089_v19  ;;  %v1731_v39 = vmul.f32 -1.442695, %v2096_v33 }
 0x189   : > { %2206 = vpow2.f32 %v1729_v26 }
 0x18a   : > { %2208 = vpow2.f32 %v1730_v29 }
 0x18b   : > { %2210 = vpow2.f32 %v1731_v39 }
 0x18c   : > { %2212 = vtanh.f32 %v2097_v42 }
 0x193   : > { %v2207_v43 = vpop.eup %2206 }
 0x194   : > { %v774_v46 = vadd.f32 1.0, %v2207_v43  ;;  %v2209_v47 = vpop.eup %2208 }
 0x195   : > { %v775_v48 = vadd.f32 1.0, %v2209_v47  ;;  %v2211_v49 = vpop.eup %2210 }
 0x196   : > { %2214 = vrcp.f32 %v774_v46  ;;  %v2213_v50 = vpop.eup %2212  ;;  %v776_v2 = vadd.f32 1.0, %v2211_v49 }
 0x197   : > { %2216 = vrcp.f32 %v775_v48 }
 0x198   : > { %2218 = vrcp.f32 %v776_v2 }
 0x1a0   : > { %v2215_v57 = vpop.eup %2214 }
 0x1a1   : > { %v786_v61 = vmul.f32 %v2215_v57, %v2213_v50  ;;  %v2217_v62 = vpop.eup %2216 }
 0x1a2   : > { %v785_v5 = vmul.f32 %v2217_v62, %v784_v58  ;;  %v2219_v7 = vpop.eup %2218 }
 0x1a4   : > { %v2876_v6 = vadd.f32 %v786_v61, %v785_v5 }
 0x1a6   : > { %2220 = vtanh.f32 %v2876_v6 }
 0x1b0   : > { %v2221_v10 = vpop.eup %2220 }
 0x1b1   : > { %v789_v11 = vmul.f32 %v2221_v10, %v2219_v7  ;;  %v1285_v10 = vld [vmem:[#allocation10 + $0x8] sm:$0xff] }
 0x1b3   : > { %927 = vmatmul.mubr.f32.vlgmr.msra.gmra.mrb[2].mxu0 %v789_v11  ;;  %998 = vmatmul.mubr.f32.vlgmr.msra.gmra.mrb[2].mxu1 %v789_v11  ;;  %v1289_v11 = vld [vmem:[#allocation10 + $0x28] sm:$0xff] }
 0x1b4   : > { %1939 = vmatpush1.bf16.msra.mxu0 %v2714_v23  ;;  %1971 = vmatpush1.bf16.msra.mxu1 %v2718_v27 }
 0x1b5   : > { %1941 = vmatprep.subr.bf16.mxu0 %v2721_v31  ;;  %1973 = vmatprep.subr.bf16.mxu1 %v2723_v32 }
 0x1b6   : > { %1169 = vmatprep.mubr.f32.mxu0 %v2467_v8  ;;  %1240 = vmatprep.mubr.f32.mxu1 %v2467_v8 }
 0x1b8   : > { %1943 = vmatpush1.bf16.msra.mxu0 %v2727_v36  ;;  %1975 = vmatpush1.bf16.msra.mxu1 %v2731_v40 }
 0x1b9   : > { %1945 = vmatprep.subr.bf16.mxu0 %v2733_v41  ;;  %1977 = vmatprep.subr.bf16.mxu1 %v2736_v45 }
 0x1bc   : > { %1947 = vmatpush1.bf16.msra.mxu0 %v2741_v52  ;;  %1979 = vmatpush1.bf16.msra.mxu1 %v2745_v54 }
 0x1bd   : > { %1949 = vmatprep.subr.bf16.mxu0 %v2747_v55  ;;  %1981 = vmatprep.subr.bf16.mxu1 %v2750_v59 }
 0x1c0   : > { %1951 = vmatpush1.bf16.msra.mxu0 %v2753_v1  ;;  %1983 = vmatpush1.bf16.msra.mxu1 %v2758_v3 }
 0x1c1   : > { %1953 = vmatprep.subr.bf16.mxu0 %v2760_v4  ;;  %1985 = vmatprep.subr.bf16.mxu1 %v2763_v9 }
 0x1c4   : > { %1955 = vmatpush1.bf16.msra.mxu0 %v2770_v16  ;;  %1987 = vmatpush1.bf16.msra.mxu1 %v2775_v17 }
 0x1c5   : > { %1957 = vmatprep.subr.bf16.mxu0 %v2777_v20  ;;  %1989 = vmatprep.subr.bf16.mxu1 %v2780_v25 }
 0x1c8   : > { %1959 = vmatpush1.bf16.msra.mxu0 %v2787_v35  ;;  %1991 = vmatpush1.bf16.msra.mxu1 %v2792_v37 }
 0x1c9   : > { %1961 = vmatprep.subr.bf16.mxu0 %v2794_v38  ;;  %1993 = vmatprep.subr.bf16.mxu1 %v2797_v44 }
 0x1cc   : > { %1963 = vmatpush1.bf16.msra.mxu0 %v2803_v51  ;;  %1995 = vmatpush1.bf16.msra.mxu1 %v2808_v53 }
 0x1cd   : > { %1965 = vmatprep.subr.bf16.mxu0 %v2810_v56  ;;  %1997 = vmatprep.subr.bf16.mxu1 %v2813_v60 }
 0x1d0   : > { %1967 = vmatpush1.bf16.msra.mxu0 %v2816_v63  ;;  %1999 = vmatpush1.bf16.msra.mxu1 %v2820_v0 }
 0x286   : > { %v928_v14 = vpop.f32.mrb[2].mxu0  ;;  %v999_v15 = vpop.f32.mrb[2].mxu1 }
 0x287   : > { %v2090_v21 = vadd.f32 %v928_v14, %v2864_v12  ;;  %v930_v22 = vpop.f32.mrb[3].mxu0  ;;  %v1001_v18 = vpop.f32.mrb[3].mxu1  ;;  %v2098_v29 = vadd.f32 %v999_v15, %v2870_v28  ;;  %v1287_v14 = vld [vmem:[#allocation10 + $0x18] sm:$0xff]  ;;  %v2000_v15 = vpack.c.bf16 %v1289_v11, %v1285_v10  ;;  %v2470_v10 = vmov (!%p1741_p10), 0.0  }
 0x288   : > { %v2091_v19 = vadd.f32 %v930_v22, %v2866_v13  ;;  %v2099_v30 = vadd.f32 %v1001_v18, %v2873_v34 }
 0x289   : > { %v1732_v24 = vmul.f32 -1.442695, %v2090_v21  ;;  %v1734_v33 = vmul.f32 -1.442695, %v2098_v29  ;;  %v1291_v21 = vld [vmem:[#allocation10 + $0x38] sm:$0xff]  ;;  %2001 = vmatprep.subr.bf16.mxu0 %v2000_v15  ;;  %v1531_v15 = vld [vmem:[#allocation11 + $0x28] sm:$0xff] (!%p1741_p10) }
 0x28a   : > { %v1733_v26 = vmul.f32 -1.442695, %v2091_v19 }
 0x28b   : > { %2222 = vpow2.f32 %v1732_v24 }
 0x28c   : > { %2224 = vpow2.f32 %v1733_v26 }
 0x28d   : > { %2226 = vtanh.f32 %v2099_v30 }
 0x28e   : > { %2228 = vpow2.f32 %v1734_v33 }
 0x295   : > { %v2223_v39 = vpop.eup %2222 }
 0x296   : > { %v1017_v42 = vadd.f32 1.0, %v2223_v39  ;;  %v2225_v43 = vpop.eup %2224 }
 0x297   : > { %v1018_v46 = vadd.f32 1.0, %v2225_v43  ;;  %v2227_v47 = vpop.eup %2226 }
 0x298   : > { %2230 = vrcp.f32 %v1017_v42  ;;  %v2229_v48 = vpop.eup %2228 }
 0x299   : > { %2232 = vrcp.f32 %v1018_v46  ;;  %v1019_v58 = vadd.f32 1.0, %v2229_v48 }
 0x29b   : > { %2234 = vrcp.f32 %v1019_v58  ;;  %v1526_v58 = vld [vmem:[#allocation11] sm:$0xff] (!%p1741_p10) }
 0x2a2   : > { %v2231_v49 = vpop.eup %2230 }
 0x2a3   : > { %v1029_v50 = vmul.f32 %v2231_v49, %v2227_v47  ;;  %v2233_v57 = vpop.eup %2232 }
 0x2a4   : > { %v1028_v61 = vmul.f32 %v2233_v57, %v2876_v6  ;;  %v2032_v6 = vpack.c.bf16 %v1291_v21, %v1287_v14  ;;  %v1530_v14 = vld [vmem:[#allocation11 + $0x20] sm:$0xff] (!%p1741_p10) }
 0x2a5   : > { %v2235_v2 = vpop.eup %2234  ;;  %v2071_v21 = vpack.c.bf16 (!%p1741_p10), %v1531_v15, %v1530_v14 }
 0x2a6   : > { %v2916_v62 = vadd.f32 %v1029_v50, %v1028_v61  ;;  %2033 = vmatprep.subr.bf16.mxu1 %v2032_v6  ;;  %v1527_v61 = vld [vmem:[#allocation11 + $0x8] sm:$0xff] (!%p1741_p10)  ;;  %v1532_v6 = vld [vmem:[#allocation11 + $0x30] sm:$0xff] (!%p1741_p10) }
 0x2a8   : > { %2236 = vtanh.f32 %v2916_v62 }
 0x2b2   : > { %v2237_v5 = vpop.eup %2236 }
 0x2b3   : > { %v1032_v7 = vmul.f32 %v2237_v5, %v2235_v2  ;;  %v2468_v2 = vmov (!%p1741_p10), 0.0|0.0   ;;  %v2065_v5 = vpack.c.bf16 (!%p1741_p10), %v1527_v61, %v1526_v58 }
 0x2b5   : > { %1170 = vmatmul.mubr.f32.vlgmr.msra.gmra.mrb[4].mxu0 %v1032_v7  ;;  %1241 = vmatmul.mubr.f32.vlgmr.msra.gmra.mrb[4].mxu1 %v1032_v7  ;;  %v1529_v7 = vld [vmem:[#allocation11 + $0x18] sm:$0xff] (!%p1741_p10) }
 0x2b6   : > { %1412 = vmatprep.mubr.f32.mxu0 %v2467_v8  ;;  %1483 = vmatprep.mubr.f32.mxu1 %v2467_v8 }
 0x2b7   : > { %2003 = vmatpush1.bf16.msra.mxu0 %v2714_v23  ;;  %2035 = vmatpush1.bf16.msra.mxu1 %v2718_v27 }
 0x2b8   : > { %2005 = vmatprep.subr.bf16.mxu0 %v2721_v31  ;;  %2037 = vmatprep.subr.bf16.mxu1 %v2723_v32 }
 0x2bb   : > { %2007 = vmatpush1.bf16.msra.mxu0 %v2727_v36  ;;  %2039 = vmatpush1.bf16.msra.mxu1 %v2731_v40 }
 0x2bc   : > { %2009 = vmatprep.subr.bf16.mxu0 %v2733_v41  ;;  %2041 = vmatprep.subr.bf16.mxu1 %v2736_v45 }
 0x2bf   : > { %2011 = vmatpush1.bf16.msra.mxu0 %v2741_v52  ;;  %2043 = vmatpush1.bf16.msra.mxu1 %v2745_v54 }
 0x2c0   : > { %2013 = vmatprep.subr.bf16.mxu0 %v2747_v55  ;;  %2045 = vmatprep.subr.bf16.mxu1 %v2750_v59 }
 0x2c3   : > { %2015 = vmatpush1.bf16.msra.mxu0 %v2753_v1  ;;  %2047 = vmatpush1.bf16.msra.mxu1 %v2758_v3 }
 0x2c4   : > { %2017 = vmatprep.subr.bf16.mxu0 %v2760_v4  ;;  %2049 = vmatprep.subr.bf16.mxu1 %v2763_v9 }
 0x2c7   : > { %2019 = vmatpush1.bf16.msra.mxu0 %v2770_v16  ;;  %2051 = vmatpush1.bf16.msra.mxu1 %v2775_v17 }
 0x2c8   : > { %2021 = vmatprep.subr.bf16.mxu0 %v2777_v20  ;;  %2053 = vmatprep.subr.bf16.mxu1 %v2780_v25 }
 0x2cb   : > { %2023 = vmatpush1.bf16.msra.mxu0 %v2787_v35  ;;  %2055 = vmatpush1.bf16.msra.mxu1 %v2792_v37 }
 0x2cc   : > { %2025 = vmatprep.subr.bf16.mxu0 %v2794_v38  ;;  %2057 = vmatprep.subr.bf16.mxu1 %v2797_v44 }
 0x2cf   : > { %2027 = vmatpush1.bf16.msra.mxu0 %v2803_v51  ;;  %2059 = vmatpush1.bf16.msra.mxu1 %v2808_v53 }
 0x2d0   : > { %2029 = vmatprep.subr.bf16.mxu0 %v2810_v56  ;;  %2061 = vmatprep.subr.bf16.mxu1 %v2813_v60 }
 0x2d3   : > { %2031 = vmatpush1.bf16.msra.mxu0 %v2816_v63  ;;  %2063 = vmatpush1.bf16.msra.mxu1 %v2820_v0 }
 0x2d4   : > { %2064 = vmatprep.subr.bf16.mxu0 (!%p1741_p10), %v2468_v2 }
 0x388   : > { %v1171_v8 = vpop.f32.mrb[4].mxu0  ;;  %v1242_v23 = vpop.f32.mrb[4].mxu1 }
 0x389   : > { %v2092_v27 = vadd.f32 %v1171_v8, %v2864_v12  ;;  %v1173_v31 = vpop.f32.mrb[5].mxu0  ;;  %v1244_v32 = vpop.f32.mrb[5].mxu1  ;;  %v2100_v45 = vadd.f32 %v1242_v23, %v2870_v28  ;;  %v1533_v8 = vld [vmem:[#allocation11 + $0x38] sm:$0xff] (!%p1741_p10) }
 0x38a   : > { %v2093_v36 = vadd.f32 %v1173_v31, %v2866_v13  ;;  %v2101_v52 = vadd.f32 %v1244_v32, %v2873_v34  ;;  %v2074_v23 = vpack.c.bf16 (!%p1741_p10), %v1533_v8, %v1532_v6  ;;  %v1535_v31 = vld [vmem:[#allocation11 + $0x48] sm:$0xff] (!%p1741_p10) }
 0x38b   : > { %v1735_v40 = vmul.f32 -1.442695, %v2092_v27  ;;  %v1737_v54 = vmul.f32 -1.442695, %v2100_v45  ;;  %v1534_v27 = vld [vmem:[#allocation11 + $0x40] sm:$0xff] (!%p1741_p10) }
 0x38c   : > { %v1736_v41 = vmul.f32 -1.442695, %v2093_v36  ;;  %v2077_v32 = vpack.c.bf16 (!%p1741_p10), %v1535_v31, %v1534_v27  ;;  %v1536_v36 = vld [vmem:[#allocation11 + $0x50] sm:$0xff] (!%p1741_p10)  ;;  %v1538_v45 = vld [vmem:[#allocation11 + $0x60] sm:$0xff] (!%p1741_p10) }
 0x38d   : > { %2238 = vpow2.f32 %v1735_v40  ;;  %v1537_v40 = vld [vmem:[#allocation11 + $0x58] sm:$0xff] (!%p1741_p10) }
 0x38e   : > { %2240 = vpow2.f32 %v1736_v41  ;;  %v2080_v41 = vpack.c.bf16 (!%p1741_p10), %v1537_v40, %v1536_v36 }
 0x38f   : > { %2242 = vtanh.f32 %v2101_v52  ;;  %v1539_v52 = vld [vmem:[#allocation11 + $0x68] sm:$0xff] (!%p1741_p10) }
 0x390   : > { %2244 = vpow2.f32 %v1737_v54  ;;  %v2083_v54 = vpack.c.bf16 (!%p1741_p10), %v1539_v52, %v1538_v45 }
 0x397   : > { %v2239_v55 = vpop.eup %2238 }
 0x398   : > { %v1260_v59 = vadd.f32 1.0, %v2239_v55  ;;  %v2241_v1 = vpop.eup %2240  ;;  %v1540_v55 = vld [vmem:[#allocation11 + $0x70] sm:$0xff] (!%p1741_p10) }
 0x399   : > { %v1261_v3 = vadd.f32 1.0, %v2241_v1  ;;  %v2243_v4 = vpop.eup %2242 }
 0x39a   : > { %2246 = vrcp.f32 %v1260_v59  ;;  %v2245_v9 = vpop.eup %2244  ;;  %v1541_v59 = vld [vmem:[#allocation11 + $0x78] sm:$0xff] (!%p1741_p10) }
 0x39b   : > { %2248 = vrcp.f32 %v1261_v3  ;;  %v1262_v25 = vadd.f32 1.0, %v2245_v9  ;;  %v2086_v1 = vpack.c.bf16 (!%p1741_p10), %v1541_v59, %v1540_v55 }
 0x39d   : > { %2250 = vrcp.f32 %v1262_v25 }
 0x3a4   : > { %v2247_v16 = vpop.eup %2246 }
 0x3a5   : > { %v1272_v17 = vmul.f32 %v2247_v16, %v2243_v4  ;;  %v2249_v20 = vpop.eup %2248  ;;  %v1742_v4 = vld [vmem:[%s3005_s5] ss:$0 sm:$0xff] (!%p1741_p10) }
 0x3a6   : > { %v1271_v35 = vmul.f32 %v2249_v20, %v2916_v62  ;;  %v1528_v62 = vld [vmem:[#allocation11 + $0x10] sm:$0xff] (!%p1741_p10) }
 0x3a7   : > { %v2251_v38 = vpop.eup %2250  ;;  %v2068_v11 = vpack.c.bf16 (!%p1741_p10), %v1529_v7, %v1528_v62 }
 0x3a8   : > { %v1273_v37 = vadd.f32 %v1272_v17, %v1271_v35 }
 0x3aa   : > { %2252 = vtanh.f32 %v1273_v37 }
 0x3b4   : > { %v2253_v44 = vpop.eup %2252 }
 0x3b5   : > { %v1275_v51 = vmul.f32 %v2253_v44, %v2251_v38 }
 0x3b7   : > { %1413 = vmatmul.mubr.f32.vlgmr.msra.gmra.mrb[6].mxu0 %v1275_v51  ;;  %1484 = vmatmul.mubr.f32.vlgmr.msra.gmra.mrb[6].mxu1 %v1275_v51 }
 0x3b8   : > { %1797 = vmatprep.mubr.msk.f32.mxu0 (!%p1741_p10), %vm2469_vm1, %v2470_v10  ;;  %2066 = vmatpush3.bf16.msra.mxu0 (!%p1741_p10), %v2065_v5 }
 0x3b9   : > { %2067 = vmatprep.subr.bf16.mxu0 (!%p1741_p10), %v2468_v2 }
 0x3bc   : > { %2069 = vmatpush3.bf16.msra.mxu0 (!%p1741_p10), %v2068_v11 }
 0x3bd   : > { %2070 = vmatprep.subr.bf16.mxu0 (!%p1741_p10), %v2468_v2 }
 0x3c0   : > { %2072 = vmatpush3.bf16.msra.mxu0 (!%p1741_p10), %v2071_v21 }
 0x3c1   : > { %2073 = vmatprep.subr.bf16.mxu0 (!%p1741_p10), %v2468_v2 }
 0x3c4   : > { %2075 = vmatpush3.bf16.msra.mxu0 (!%p1741_p10), %v2074_v23 }
 0x3c5   : > { %2076 = vmatprep.subr.bf16.mxu0 (!%p1741_p10), %v2468_v2 }
 0x3c8   : > { %2078 = vmatpush3.bf16.msra.mxu0 (!%p1741_p10), %v2077_v32 }
 0x3c9   : > { %2079 = vmatprep.subr.bf16.mxu0 (!%p1741_p10), %v2468_v2 }
 0x3cc   : > { %2081 = vmatpush3.bf16.msra.mxu0 (!%p1741_p10), %v2080_v41 }
 0x3cd   : > { %2082 = vmatprep.subr.bf16.mxu0 (!%p1741_p10), %v2468_v2 }
 0x3d0   : > { %2084 = vmatpush3.bf16.msra.mxu0 (!%p1741_p10), %v2083_v54 }
 0x3d1   : > { %2085 = vmatprep.subr.bf16.mxu0 (!%p1741_p10), %v2468_v2 }
 0x3d4   : > { %2087 = vmatpush3.bf16.msra.mxu0 (!%p1741_p10), %v2086_v1 }
 0x48a   : > { %v1414_v53 = vpop.f32.mrb[6].mxu0  ;;  %v1485_v56 = vpop.f32.mrb[6].mxu1 }
 0x48b   : > { %v2094_v60 = vadd.f32 %v1414_v53, %v2864_v12  ;;  %v1416_v63 = vpop.f32.mrb[7].mxu0  ;;  %v1487_v0 = vpop.f32.mrb[7].mxu1  ;;  %v2102_v24 = vadd.f32 %v1485_v56, %v2870_v28 }
 0x48c   : > { %v2095_v22 = vadd.f32 %v1416_v63, %v2866_v13  ;;  %v2103_v26 = vadd.f32 %v1487_v0, %v2873_v34 }
 0x48d   : > { %v1738_v18 = vmul.f32 -1.442695, %v2094_v60  ;;  %v1740_v29 = vmul.f32 -1.442695, %v2102_v24 }
 0x48e   : > { %v1739_v19 = vmul.f32 -1.442695, %v2095_v22 }
 0x48f   : > { %2254 = vpow2.f32 %v1738_v18 }
 0x490   : > { %2256 = vpow2.f32 %v1739_v19 }
 0x491   : > { %2258 = vtanh.f32 %v2103_v26 }
 0x492   : > { %2260 = vpow2.f32 %v1740_v29 }
 0x499   : > { %v2255_v30 = vpop.eup %2254 }
 0x49a   : > { %v1503_v33 = vadd.f32 1.0, %v2255_v30  ;;  %v2257_v39 = vpop.eup %2256 }
 0x49b   : > { %v1504_v12 = vadd.f32 1.0, %v2257_v39  ;;  %v2259_v42 = vpop.eup %2258 }
 0x49c   : > { %2262 = vrcp.f32 %v1503_v33  ;;  %v2261_v43 = vpop.eup %2260 }
 0x49d   : > { %2264 = vrcp.f32 %v1504_v12  ;;  %v1505_v48 = vadd.f32 1.0, %v2261_v43 }
 0x49f   : > { %2266 = vrcp.f32 %v1505_v48 }
 0x4a6   : > { %v2263_v13 = vpop.eup %2262 }
 0x4a7   : > { %v1515_v46 = vmul.f32 %v2263_v13, %v2259_v42  ;;  %v2265_v47 = vpop.eup %2264 }
 0x4a8   : > { %v1514_v49 = vmul.f32 %v2265_v47, %v1273_v37 }
 0x4a9   : > { %v2267_v28 = vpop.eup %2266 }
 0x4aa   : > { %v1516_v50 = vadd.f32 %v1515_v46, %v1514_v49 }
 0x4ac   : > { %2268 = vtanh.f32 %v1516_v50  ;;  %1520 = vst [vmem:[#allocation3] sm:$0xff] %v1516_v50 }
 0x4b3   : > { %1524 = sbr.rel (%p1741_p10) target bundleno = 1432 (0x598), region = 68 }
 0x4b6   : > { %v2269_v34 = vpop.eup %2268 }
 0x4b7   : > { %v1518_v57 = vmul.f32 %v2269_v34, %v2267_v28 }
 0x4b9   : > { %1519 = vst [vmem:[#allocation2] sm:$0xff] %v1518_v57 }
 0x4c0   : > { %v1525_v3 = vld [vmem:[#allocation2] sm:$0xff] }
 0x4c1   : > { %1798 = vmatmul.mubr.f32.vlgmr.msra.gmra.mrb[0].mxu0 %v1525_v3 }
 0x594   : > { %v1615_v9 = vpop.f32.mrb[0].mxu0 }
 0x595   : > { %v1616_v16 = vadd.f32 %v1742_v4, %v1615_v9  ;;  %v1799_v17 = vpop.f32.mrb[1].mxu0 }
 0x597   : > { %1619 = vst [vmem:[#allocation13] sm:$0xff] %v1616_v16 }
 0x598 PF: > { %p2159_p12 = scmp.eq.s32.totalorder %s2526_s25, 1  ;;  %s2471_s12 = smov [#allocation13]  }
 0x599   : > { %s1627_s13 = sshll.u32 %s2471_s12, 4  ;;  %s1628_s13 = int_to_ptr.vmem [resolvable:$true] %s1627_s13 }
 0x59a   : > { %s2384_s14 = scalar_lea.vmem %s1628_s13, 128  ;;  %p2391_p9 = scmp.lt.s32.totalorder %s1628_s13, %s1628_s13 }
 0x59b   : > { %p2385_p13 = scmp.ne.s32.totalorder %s1628_s13, %s2384_s14  ;;  %p2392_p11 = scmp.lt.s32.totalorder %s2384_s14, %s2384_s14 }
 0x59d   : > { %p2386_p0 = pnand %p2385_p13, %p2159_p12  ;;  %p2393_p2 = por %p2392_p11, %p2391_p9 }
 0x59f   : > { %p2387_p3 = pneg %p2386_p0 }
 0x5a1   : > { %p2394_p7 = pnand %p2393_p2, %p2387_p3 }
 0x5a3   : > { %2397 = shalt.err (!%p2394_p7)
}
 0x5a4   : > { %s2398_s18 = scalar_lea.hbm %s3006_s6, 128 }
 0x5a5   : > { %p2399_p1 = scmp.ne.s32.totalorder %s3006_s6, %s2398_s18  ;;  %p2404_p5 = scmp.lt.u32.totalorder %s2398_s18, %s3006_s6 }
 0x5a7   : > { %p2400_p8 = pnand %p2399_p1, %p2159_p12 }
 0x5a9   : > { %p2401_p4 = pneg %p2400_p8 }
 0x5ab   : > { %p2406_p6 = pnand %p2404_p5, %p2401_p4 }
 0x5ad   : > { %2409 = shalt.err (!%p2406_p6)
}
 0x5ae   : > { %2135 = dma.vmem_to_hbm [thread:$0]  (%p2159_p12), %s1628_s13, 128, %s3006_s6, [#allocation7]  }
 0x5af   : > { %2439 = dma.done.wait (%p2159_p12), [#allocation7], 128  }
 0x5b0   : > { %2441 = vsyncadd (%p2159_p12), [#allocation7], 4294967168 }
 0x5b1 PF: > { %p19_p10 = scmp.ge.s32.totalorder %s2632_s17, 4   ;;  %s3022_s21 = smov %s2448_s22 }
 0x5b2   : > { %s3023_s22 = smov %s2452_s23  ;;  %s3024_s23 = smov %s2642_s19 }
 0x5b3   : > { %s3025_s24 = smov %s2632_s17  ;;  %21 = sbr.rel (!%p19_p10) target bundleno = 6 (0x6), region = 104 }
 0x5ba   :  { %1640 = vsyncpa [#allocation6], 1 }
 0x5bb   :  { %1642 = vsyncpa [#allocation6 + $0x1], 1 }
 0x5bc   :  { %1643 = vsyncpa [#allocation9], 1 }
 0x5bd   :  { %1644 = vsyncpa [#allocation12], 1 }
 0x5be   :  { %1645 = vsyncpa [#allocation7], 1 }
 0x5bf   :  { %1647 = vsyncpa [#allocation7 + $0x1], 1 }

</bundles_post_ra>
